<compile_context>
chip_gen: v6e
topology: v6e:2x2x1
jax: 0.10.0
libtpu: 0.0.40
codegen_flags: <defaults>
</compile_context>

<pallas_src>
import jax
import jax.numpy as jnp
import numpy as np
from jax.experimental import pallas as pl
from jax.experimental.pallas import tpu as pltpu

KS = 7     # kernel_size (7 -> padding 3, the PyTorch default)
PAD = 3
OFF = 8    # sublane offset of the valid rows inside the padded scratch


def _banded_weights(conv_weight, width):
    """Fold the dx (lane) accumulation + lane zero-padding into matrices.

    Returns B of shape (2, KS, W, W) with
      B[c, dy, w_in, w_out] = k[c, dy, w_in - w_out + PAD]   (0 elsewhere)
    so that (row_slab @ B[c, dy]) performs the dx sum of the 7x7 conv.
    """
    k = jnp.asarray(conv_weight, jnp.float32).reshape(2, KS, KS)
    w_in = jnp.arange(width)[:, None]
    w_out = jnp.arange(width)[None, :]
    dx = w_in - w_out + PAD                        # (W, W)
    valid = (dx >= 0) & (dx < KS)
    dx_c = jnp.clip(dx, 0, KS - 1)
    return jnp.where(valid[None, None], k[:, :, dx_c], 0.0)   # (2, KS, W, W)


def spatial_attention(x, conv_weight, *, nb=1, ct=None):
    """x: (N, C, H, W); conv_weight: (1, 2, KS, KS). Returns (N, 1, H, W)."""
    N, C, H, W = x.shape
    ct = C if ct is None else ct
    assert N % nb == 0, (N, nb)
    assert C % ct == 0, (C, ct)
    inv_c = 1.0 / C
    pad_rows = OFF + H + 8    # aligned top band + interior + aligned bottom band

    b = _banded_weights(conv_weight, W)            # (2, KS, W, W) f32

    def kernel(b_ref, x_ref, o_ref, sum_ref, max_ref, pad_ref):
        j = pl.program_id(1)

        x_blk = x_ref[...].astype(jnp.float32)     # (nb, ct, H, W)
        part_sum = jnp.sum(x_blk, axis=1)          # (nb, H, W)
        part_max = jnp.max(x_blk, axis=1)          # (nb, H, W)

        @pl.when(j == 0)
        def _():
            sum_ref[...] = part_sum
            max_ref[...] = part_max

        @pl.when(j > 0)
        def _():
            sum_ref[...] = sum_ref[...] + part_sum
            max_ref[...] = jnp.maximum(max_ref[...], part_max)

        @pl.when(j == pl.num_programs(1) - 1)
        def _():
            # Zero only the two aligned 8-row halo bands; the interior is
            # fully rewritten below for every image.
            pad_ref[:, 0:OFF, :] = jnp.zeros((2, OFF, W), jnp.float32)
            pad_ref[:, OFF + H:OFF + H + 8, :] = jnp.zeros((2, 8, W), jnp.float32)

            for i in range(nb):                    # static batch-pack unroll
                # Aligned, full-lane-width interior stores.
                pad_ref[0, OFF:OFF + H, :] = sum_ref[i] * inv_c   # channel mean
                pad_ref[1, OFF:OFF + H, :] = max_ref[i]           # channel max

                # 14 MXU matmuls; two independent accumulators (ILP).
                acc0 = jnp.zeros((H, W), jnp.float32)
                acc1 = jnp.zeros((H, W), jnp.float32)
                for dy in range(KS):
                    r = OFF - PAD + dy
                    acc0 = acc0 + jnp.dot(
                        pad_ref[0, r:r + H, :], b_ref[0, dy],
                        preferred_element_type=jnp.float32,
                        precision=jax.lax.Precision.HIGHEST)
                    acc1 = acc1 + jnp.dot(
                        pad_ref[1, r:r + H, :], b_ref[1, dy],
                        preferred_element_type=jnp.float32,
                        precision=jax.lax.Precision.HIGHEST)

                o_ref[i, 0] = jax.nn.sigmoid(acc0 + acc1).astype(o_ref.dtype)

    return pl.pallas_call(
        kernel,
        out_shape=jax.ShapeDtypeStruct((N, 1, H, W), x.dtype),
        grid=(N // nb, C // ct),
        in_specs=[
            # Banded conv weights: resident in VMEM, same block every step.
            pl.BlockSpec((2, KS, W, W), lambda i, j: (0, 0, 0, 0)),
            # Input: batch-packed block, channel-tiled along the last grid axis.
            pl.BlockSpec((nb, ct, H, W), lambda i, j: (i, j, 0, 0)),
        ],
        # Output block is revisited across the channel axis and written only
        # at the last channel step (accumulator-style residency).
        out_specs=pl.BlockSpec((nb, 1, H, W), lambda i, j: (i, 0, 0, 0)),
        scratch_shapes=[
            pltpu.VMEM((nb, H, W), jnp.float32),         # running channel sum
            pltpu.VMEM((nb, H, W), jnp.float32),         # running channel max
            pltpu.VMEM((2, pad_rows, W), jnp.float32),   # sublane-padded maps
        ],
        compiler_params=pltpu.CompilerParams(
            dimension_semantics=("parallel", "arbitrary"),
            vmem_limit_bytes=32 * 1024 * 1024,
        ),
    )(b, x)


def reference(x, conv_weight):
    """Pure-JAX reference mirroring the PyTorch forward."""
    avg = jnp.mean(x, axis=1, keepdims=True)
    mx = jnp.max(x, axis=1, keepdims=True)
    inp = jnp.concatenate([avg, mx], axis=1)
    out = jax.lax.conv_general_dilated(
        inp, conv_weight, window_strides=(1, 1),
        padding=((PAD, PAD), (PAD, PAD)),
        dimension_numbers=("NCHW", "OIHW", "NCHW"),
        precision=jax.lax.Precision.HIGHEST)
    return jax.nn.sigmoid(out)


if __name__ == "__main__":
    key = jax.random.PRNGKey(0)
    kx, kw = jax.random.split(key)

    N, C, H, W = 2, 4, 16, 16
    x = jax.random.normal(kx, (N, C, H, W), dtype=jnp.float32)

    # Deterministic conv1 weight init (Kaiming-uniform-like bound, as nn.Conv2d).
    fan_in = 2 * KS * KS
    bound = 1.0 / np.sqrt(fan_in)
    conv_w = jax.random.uniform(kw, (1, 2, KS, KS), dtype=jnp.float32,
                                minval=-bound, maxval=bound)

    ref = reference(x, conv_w)

    # Channel-tiled accumulation path (grid = (2, 2)).
    out1 = jax.block_until_ready(spatial_attention(x, conv_w, nb=1, ct=2))
    # Batch-packed path (grid = (1, 1), whole C in one step).
    out2 = jax.block_until_ready(spatial_attention(x, conv_w, nb=2, ct=4))

    assert out1.shape == (N, 1, H, W), out1.shape
    np.testing.assert_allclose(np.asarray(out1), np.asarray(ref),
                               rtol=1e-4, atol=1e-4)
    np.testing.assert_allclose(np.asarray(out2), np.asarray(ref),
                               rtol=1e-4, atol=1e-4)
    print("KERNEL_OK")
</pallas_src>

<mosaic_0001>
module attributes {stable_mosaic.version = 11 : i64} {
  func.func @kernel(%arg0: i32, %arg1: i32, %arg2: memref<2x7x16x16xf32, #tpu.memory_space<vmem>>, %arg3: memref<1x2x16x16xf32, #tpu.memory_space<vmem>>, %arg4: memref<1x1x16x16xf32, #tpu.memory_space<vmem>>, %arg5: memref<1x16x16xf32, #tpu.memory_space<vmem>>, %arg6: memref<1x16x16xf32, #tpu.memory_space<vmem>>, %arg7: memref<2x32x16xf32, #tpu.memory_space<vmem>>) attributes {dimension_semantics = [#tpu.dimension_semantics<parallel>, #tpu.dimension_semantics<arbitrary>], iteration_bounds = array<i64: 2, 2>, scalar_prefetch = 0 : i64, scratch_operands = 3 : i64, tpu.core_type = #tpu.core_type<tc>, window_params = [{pipeline_mode = #tpu.pipeline_mode<synchronous>, transform_indices = @transform_0, window_bounds = array<i64: 2, 7, 16, 16>}, {transform_indices = @transform_1, window_bounds = array<i64: 1, 2, 16, 16>}, {transform_indices = @transform_2, window_bounds = array<i64: 1, 1, 16, 16>}]} {
    %c0 = arith.constant 0 : index
    %c0_0 = arith.constant 0 : index
    %c0_1 = arith.constant 0 : index
    %c0_2 = arith.constant 0 : index
    %0 = vector.load %arg3[%c0, %c0_0, %c0_1, %c0_2] : memref<1x2x16x16xf32, #tpu.memory_space<vmem>>, vector<1x2x16x16xf32>
    %cst = arith.constant dense<0.000000e+00> : vector<1x16x16xf32>
    %1 = vector.multi_reduction <add>, %0, %cst [1] : vector<1x2x16x16xf32> to vector<1x16x16xf32>
    %cst_3 = arith.constant dense<0xFF800000> : vector<1x16x16xf32>
    %2 = vector.multi_reduction <maximumf>, %0, %cst_3 [1] : vector<1x2x16x16xf32> to vector<1x16x16xf32>
    %c0_i32 = arith.constant 0 : i32
    %3 = arith.cmpi eq, %arg1, %c0_i32 : i32
    %4 = arith.extui %3 : i1 to i32
    %c0_i32_4 = arith.constant 0 : i32
    %5 = arith.cmpi ne, %4, %c0_i32_4 : i32
    scf.if %5 {
      %c0_8 = arith.constant 0 : index
      %c0_9 = arith.constant 0 : index
      %c0_10 = arith.constant 0 : index
      %12 = vector.load %arg5[%c0_8, %c0_9, %c0_10] : memref<1x16x16xf32, #tpu.memory_space<vmem>>, vector<1x16x16xf32>
      tpu.vector_store %arg5[%c0_8, %c0_9, %c0_10], %1 {strides = array<i32>} : memref<1x16x16xf32, #tpu.memory_space<vmem>>, vector<1x16x16xf32>,
      %c0_11 = arith.constant 0 : index
      %c0_12 = arith.constant 0 : index
      %c0_13 = arith.constant 0 : index
      %13 = vector.load %arg6[%c0_11, %c0_12, %c0_13] : memref<1x16x16xf32, #tpu.memory_space<vmem>>, vector<1x16x16xf32>
      tpu.vector_store %arg6[%c0_11, %c0_12, %c0_13], %2 {strides = array<i32>} : memref<1x16x16xf32, #tpu.memory_space<vmem>>, vector<1x16x16xf32>,
    } else {
    }
    %c0_i32_5 = arith.constant 0 : i32
    %6 = arith.cmpi sgt, %arg1, %c0_i32_5 : i32
    %7 = arith.extui %6 : i1 to i32
    %c0_i32_6 = arith.constant 0 : i32
    %8 = arith.cmpi ne, %7, %c0_i32_6 : i32
    scf.if %8 {
      %c0_8 = arith.constant 0 : index
      %c0_9 = arith.constant 0 : index
      %c0_10 = arith.constant 0 : index
      %12 = vector.load %arg5[%c0_8, %c0_9, %c0_10] : memref<1x16x16xf32, #tpu.memory_space<vmem>>, vector<1x16x16xf32>
      %13 = arith.addf %12, %1 : vector<1x16x16xf32>
      %c0_11 = arith.constant 0 : index
      %c0_12 = arith.constant 0 : index
      %c0_13 = arith.constant 0 : index
      %14 = vector.load %arg5[%c0_11, %c0_12, %c0_13] : memref<1x16x16xf32, #tpu.memory_space<vmem>>, vector<1x16x16xf32>
      tpu.vector_store %arg5[%c0_11, %c0_12, %c0_13], %13 {strides = array<i32>} : memref<1x16x16xf32, #tpu.memory_space<vmem>>, vector<1x16x16xf32>,
      %c0_14 = arith.constant 0 : index
      %c0_15 = arith.constant 0 : index
      %c0_16 = arith.constant 0 : index
      %15 = vector.load %arg6[%c0_14, %c0_15, %c0_16] : memref<1x16x16xf32, #tpu.memory_space<vmem>>, vector<1x16x16xf32>
      %16 = arith.maximumf %15, %2 : vector<1x16x16xf32>
      %c0_17 = arith.constant 0 : index
      %c0_18 = arith.constant 0 : index
      %c0_19 = arith.constant 0 : index
      %17 = vector.load %arg6[%c0_17, %c0_18, %c0_19] : memref<1x16x16xf32, #tpu.memory_space<vmem>>, vector<1x16x16xf32>
      tpu.vector_store %arg6[%c0_17, %c0_18, %c0_19], %16 {strides = array<i32>} : memref<1x16x16xf32, #tpu.memory_space<vmem>>, vector<1x16x16xf32>,
    } else {
    }
    %c1_i32 = arith.constant 1 : i32
    %9 = arith.cmpi eq, %arg1, %c1_i32 : i32
    %10 = arith.extui %9 : i1 to i32
    %c0_i32_7 = arith.constant 0 : i32
    %11 = arith.cmpi ne, %10, %c0_i32_7 : i32
    scf.if %11 {
      %cst_8 = arith.constant 0.000000e+00 : f32
      %12 = vector.broadcast %cst_8 : f32 to vector<2x8x16xf32>
      %c0_9 = arith.constant 0 : index
      %c0_10 = arith.constant 0 : index
      %c0_11 = arith.constant 0 : index
      %13 = vector.load %arg7[%c0_9, %c0_10, %c0_11] : memref<2x32x16xf32, #tpu.memory_space<vmem>>, vector<2x8x16xf32>
      tpu.vector_store %arg7[%c0_9, %c0_10, %c0_11], %12 {strides = array<i32>} : memref<2x32x16xf32, #tpu.memory_space<vmem>>, vector<2x8x16xf32>,
      %cst_12 = arith.constant 0.000000e+00 : f32
      %14 = vector.broadcast %cst_12 : f32 to vector<2x8x16xf32>
      %c0_13 = arith.constant 0 : index
      %c24 = arith.constant 24 : index
      %c0_14 = arith.constant 0 : index
      %15 = vector.load %arg7[%c0_13, %c24, %c0_14] : memref<2x32x16xf32, #tpu.memory_space<vmem>>, vector<2x8x16xf32>
      tpu.vector_store %arg7[%c0_13, %c24, %c0_14], %14 {strides = array<i32>} : memref<2x32x16xf32, #tpu.memory_space<vmem>>, vector<2x8x16xf32>,
      %c0_15 = arith.constant 0 : index
      %c0_16 = arith.constant 0 : index
      %c0_17 = arith.constant 0 : index
      %16 = vector.load %arg5[%c0_15, %c0_16, %c0_17] : memref<1x16x16xf32, #tpu.memory_space<vmem>>, vector<1x16x16xf32>
      %17 = vector.shape_cast %16 : vector<1x16x16xf32> to vector<16x16xf32>
      %cst_18 = arith.constant 2.500000e-01 : f32
      %18 = vector.broadcast %cst_18 : f32 to vector<16x16xf32>
      %19 = arith.mulf %17, %18 : vector<16x16xf32>
      %c0_19 = arith.constant 0 : index
      %c8 = arith.constant 8 : index
      %c0_20 = arith.constant 0 : index
      %20 = vector.load %arg7[%c0_19, %c8, %c0_20] : memref<2x32x16xf32, #tpu.memory_space<vmem>>, vector<1x16x16xf32>
      %21 = vector.shape_cast %20 : vector<1x16x16xf32> to vector<16x16xf32>
      %22 = vector.shape_cast %19 : vector<16x16xf32> to vector<1x16x16xf32>
      tpu.vector_store %arg7[%c0_19, %c8, %c0_20], %22 {strides = array<i32>} : memref<2x32x16xf32, #tpu.memory_space<vmem>>, vector<1x16x16xf32>,
      %c0_21 = arith.constant 0 : index
      %c0_22 = arith.constant 0 : index
      %c0_23 = arith.constant 0 : index
      %23 = vector.load %arg6[%c0_21, %c0_22, %c0_23] : memref<1x16x16xf32, #tpu.memory_space<vmem>>, vector<1x16x16xf32>
      %24 = vector.shape_cast %23 : vector<1x16x16xf32> to vector<16x16xf32>
      %c1 = arith.constant 1 : index
      %c8_24 = arith.constant 8 : index
      %c0_25 = arith.constant 0 : index
      %25 = vector.load %arg7[%c1, %c8_24, %c0_25] : memref<2x32x16xf32, #tpu.memory_space<vmem>>, vector<1x16x16xf32>
      %26 = vector.shape_cast %25 : vector<1x16x16xf32> to vector<16x16xf32>
      %27 = vector.shape_cast %24 : vector<16x16xf32> to vector<1x16x16xf32>
      tpu.vector_store %arg7[%c1, %c8_24, %c0_25], %27 {strides = array<i32>} : memref<2x32x16xf32, #tpu.memory_space<vmem>>, vector<1x16x16xf32>,
      %cst_26 = arith.constant 0.000000e+00 : f32
      %28 = vector.broadcast %cst_26 : f32 to vector<16x16xf32>
      %cst_27 = arith.constant 0.000000e+00 : f32
      %29 = vector.broadcast %cst_27 : f32 to vector<16x16xf32>
      %c0_28 = arith.constant 0 : index
      %c5 = arith.constant 5 : index
      %c0_29 = arith.constant 0 : index
      %30 = vector.load %arg7[%c0_28, %c5, %c0_29] : memref<2x32x16xf32, #tpu.memory_space<vmem>>, vector<1x16x16xf32>
      %31 = vector.shape_cast %30 : vector<1x16x16xf32> to vector<16x16xf32>
      %c0_30 = arith.constant 0 : index
      %c0_31 = arith.constant 0 : index
      %c0_32 = arith.constant 0 : index
      %c0_33 = arith.constant 0 : index
      %32 = vector.load %arg2[%c0_30, %c0_31, %c0_32, %c0_33] : memref<2x7x16x16xf32, #tpu.memory_space<vmem>>, vector<1x1x16x16xf32>
      %33 = vector.shape_cast %32 : vector<1x1x16x16xf32> to vector<16x16xf32>
      %cst_34 = arith.constant dense<0.000000e+00> : vector<16x16xf32>
      %34 = tpu.matmul %31, %33, %cst_34 {dimension_numbers = #tpu.dot_dimension_numbers<[1], [0], [0], [1], [0, 0, 1, 1], [], []>, precision = #tpu.contract_precision<fp32>} : vector<16x16xf32>, vector<16x16xf32>, vector<16x16xf32> -> vector<16x16xf32>
      %35 = arith.addf %28, %34 : vector<16x16xf32>
      %c1_35 = arith.constant 1 : index
      %c5_36 = arith.constant 5 : index
      %c0_37 = arith.constant 0 : index
      %36 = vector.load %arg7[%c1_35, %c5_36, %c0_37] : memref<2x32x16xf32, #tpu.memory_space<vmem>>, vector<1x16x16xf32>
      %37 = vector.shape_cast %36 : vector<1x16x16xf32> to vector<16x16xf32>
      %c1_38 = arith.constant 1 : index
      %c0_39 = arith.constant 0 : index
      %c0_40 = arith.constant 0 : index
      %c0_41 = arith.constant 0 : index
      %38 = vector.load %arg2[%c1_38, %c0_39, %c0_40, %c0_41] : memref<2x7x16x16xf32, #tpu.memory_space<vmem>>, vector<1x1x16x16xf32>
      %39 = vector.shape_cast %38 : vector<1x1x16x16xf32> to vector<16x16xf32>
      %cst_42 = arith.constant dense<0.000000e+00> : vector<16x16xf32>
      %40 = tpu.matmul %37, %39, %cst_42 {dimension_numbers = #tpu.dot_dimension_numbers<[1], [0], [0], [1], [0, 0, 1, 1], [], []>, precision = #tpu.contract_precision<fp32>} : vector<16x16xf32>, vector<16x16xf32>, vector<16x16xf32> -> vector<16x16xf32>
      %41 = arith.addf %29, %40 : vector<16x16xf32>
      %c0_43 = arith.constant 0 : index
      %c6 = arith.constant 6 : index
      %c0_44 = arith.constant 0 : index
      %42 = vector.load %arg7[%c0_43, %c6, %c0_44] : memref<2x32x16xf32, #tpu.memory_space<vmem>>, vector<1x16x16xf32>
      %43 = vector.shape_cast %42 : vector<1x16x16xf32> to vector<16x16xf32>
      %c0_45 = arith.constant 0 : index
      %c1_46 = arith.constant 1 : index
      %c0_47 = arith.constant 0 : index
      %c0_48 = arith.constant 0 : index
      %44 = vector.load %arg2[%c0_45, %c1_46, %c0_47, %c0_48] : memref<2x7x16x16xf32, #tpu.memory_space<vmem>>, vector<1x1x16x16xf32>
      %45 = vector.shape_cast %44 : vector<1x1x16x16xf32> to vector<16x16xf32>
      %cst_49 = arith.constant dense<0.000000e+00> : vector<16x16xf32>
      %46 = tpu.matmul %43, %45, %cst_49 {dimension_numbers = #tpu.dot_dimension_numbers<[1], [0], [0], [1], [0, 0, 1, 1], [], []>, precision = #tpu.contract_precision<fp32>} : vector<16x16xf32>, vector<16x16xf32>, vector<16x16xf32> -> vector<16x16xf32>
      %47 = arith.addf %35, %46 : vector<16x16xf32>
      %c1_50 = arith.constant 1 : index
      %c6_51 = arith.constant 6 : index
      %c0_52 = arith.constant 0 : index
      %48 = vector.load %arg7[%c1_50, %c6_51, %c0_52] : memref<2x32x16xf32, #tpu.memory_space<vmem>>, vector<1x16x16xf32>
      %49 = vector.shape_cast %48 : vector<1x16x16xf32> to vector<16x16xf32>
      %c1_53 = arith.constant 1 : index
      %c1_54 = arith.constant 1 : index
      %c0_55 = arith.constant 0 : index
      %c0_56 = arith.constant 0 : index
      %50 = vector.load %arg2[%c1_53, %c1_54, %c0_55, %c0_56] : memref<2x7x16x16xf32, #tpu.memory_space<vmem>>, vector<1x1x16x16xf32>
      %51 = vector.shape_cast %50 : vector<1x1x16x16xf32> to vector<16x16xf32>
      %cst_57 = arith.constant dense<0.000000e+00> : vector<16x16xf32>
      %52 = tpu.matmul %49, %51, %cst_57 {dimension_numbers = #tpu.dot_dimension_numbers<[1], [0], [0], [1], [0, 0, 1, 1], [], []>, precision = #tpu.contract_precision<fp32>} : vector<16x16xf32>, vector<16x16xf32>, vector<16x16xf32> -> vector<16x16xf32>
      %53 = arith.addf %41, %52 : vector<16x16xf32>
      %c0_58 = arith.constant 0 : index
      %c7 = arith.constant 7 : index
      %c0_59 = arith.constant 0 : index
      %54 = vector.load %arg7[%c0_58, %c7, %c0_59] : memref<2x32x16xf32, #tpu.memory_space<vmem>>, vector<1x16x16xf32>
      %55 = vector.shape_cast %54 : vector<1x16x16xf32> to vector<16x16xf32>
      %c0_60 = arith.constant 0 : index
      %c2 = arith.constant 2 : index
      %c0_61 = arith.constant 0 : index
      %c0_62 = arith.constant 0 : index
      %56 = vector.load %arg2[%c0_60, %c2, %c0_61, %c0_62] : memref<2x7x16x16xf32, #tpu.memory_space<vmem>>, vector<1x1x16x16xf32>
      %57 = vector.shape_cast %56 : vector<1x1x16x16xf32> to vector<16x16xf32>
      %cst_63 = arith.constant dense<0.000000e+00> : vector<16x16xf32>
      %58 = tpu.matmul %55, %57, %cst_63 {dimension_numbers = #tpu.dot_dimension_numbers<[1], [0], [0], [1], [0, 0, 1, 1], [], []>, precision = #tpu.contract_precision<fp32>} : vector<16x16xf32>, vector<16x16xf32>, vector<16x16xf32> -> vector<16x16xf32>
      %59 = arith.addf %47, %58 : vector<16x16xf32>
      %c1_64 = arith.constant 1 : index
      %c7_65 = arith.constant 7 : index
      %c0_66 = arith.constant 0 : index
      %60 = vector.load %arg7[%c1_64, %c7_65, %c0_66] : memref<2x32x16xf32, #tpu.memory_space<vmem>>, vector<1x16x16xf32>
      %61 = vector.shape_cast %60 : vector<1x16x16xf32> to vector<16x16xf32>
      %c1_67 = arith.constant 1 : index
      %c2_68 = arith.constant 2 : index
      %c0_69 = arith.constant 0 : index
      %c0_70 = arith.constant 0 : index
      %62 = vector.load %arg2[%c1_67, %c2_68, %c0_69, %c0_70] : memref<2x7x16x16xf32, #tpu.memory_space<vmem>>, vector<1x1x16x16xf32>
      %63 = vector.shape_cast %62 : vector<1x1x16x16xf32> to vector<16x16xf32>
      %cst_71 = arith.constant dense<0.000000e+00> : vector<16x16xf32>
      %64 = tpu.matmul %61, %63, %cst_71 {dimension_numbers = #tpu.dot_dimension_numbers<[1], [0], [0], [1], [0, 0, 1, 1], [], []>, precision = #tpu.contract_precision<fp32>} : vector<16x16xf32>, vector<16x16xf32>, vector<16x16xf32> -> vector<16x16xf32>
      %65 = arith.addf %53, %64 : vector<16x16xf32>
      %c0_72 = arith.constant 0 : index
      %c8_73 = arith.constant 8 : index
      %c0_74 = arith.constant 0 : index
      %66 = vector.load %arg7[%c0_72, %c8_73, %c0_74] : memref<2x32x16xf32, #tpu.memory_space<vmem>>, vector<1x16x16xf32>
      %67 = vector.shape_cast %66 : vector<1x16x16xf32> to vector<16x16xf32>
      %c0_75 = arith.constant 0 : index
      %c3 = arith.constant 3 : index
      %c0_76 = arith.constant 0 : index
      %c0_77 = arith.constant 0 : index
      %68 = vector.load %arg2[%c0_75, %c3, %c0_76, %c0_77] : memref<2x7x16x16xf32, #tpu.memory_space<vmem>>, vector<1x1x16x16xf32>
      %69 = vector.shape_cast %68 : vector<1x1x16x16xf32> to vector<16x16xf32>
      %cst_78 = arith.constant dense<0.000000e+00> : vector<16x16xf32>
      %70 = tpu.matmul %67, %69, %cst_78 {dimension_numbers = #tpu.dot_dimension_numbers<[1], [0], [0], [1], [0, 0, 1, 1], [], []>, precision = #tpu.contract_precision<fp32>} : vector<16x16xf32>, vector<16x16xf32>, vector<16x16xf32> -> vector<16x16xf32>
      %71 = arith.addf %59, %70 : vector<16x16xf32>
      %c1_79 = arith.constant 1 : index
      %c8_80 = arith.constant 8 : index
      %c0_81 = arith.constant 0 : index
      %72 = vector.load %arg7[%c1_79, %c8_80, %c0_81] : memref<2x32x16xf32, #tpu.memory_space<vmem>>, vector<1x16x16xf32>
      %73 = vector.shape_cast %72 : vector<1x16x16xf32> to vector<16x16xf32>
      %c1_82 = arith.constant 1 : index
      %c3_83 = arith.constant 3 : index
      %c0_84 = arith.constant 0 : index
      %c0_85 = arith.constant 0 : index
      %74 = vector.load %arg2[%c1_82, %c3_83, %c0_84, %c0_85] : memref<2x7x16x16xf32, #tpu.memory_space<vmem>>, vector<1x1x16x16xf32>
      %75 = vector.shape_cast %74 : vector<1x1x16x16xf32> to vector<16x16xf32>
      %cst_86 = arith.constant dense<0.000000e+00> : vector<16x16xf32>
      %76 = tpu.matmul %73, %75, %cst_86 {dimension_numbers = #tpu.dot_dimension_numbers<[1], [0], [0], [1], [0, 0, 1, 1], [], []>, precision = #tpu.contract_precision<fp32>} : vector<16x16xf32>, vector<16x16xf32>, vector<16x16xf32> -> vector<16x16xf32>
      %77 = arith.addf %65, %76 : vector<16x16xf32>
      %c0_87 = arith.constant 0 : index
      %c9 = arith.constant 9 : index
      %c0_88 = arith.constant 0 : index
      %78 = vector.load %arg7[%c0_87, %c9, %c0_88] : memref<2x32x16xf32, #tpu.memory_space<vmem>>, vector<1x16x16xf32>
      %79 = vector.shape_cast %78 : vector<1x16x16xf32> to vector<16x16xf32>
      %c0_89 = arith.constant 0 : index
      %c4 = arith.constant 4 : index
      %c0_90 = arith.constant 0 : index
      %c0_91 = arith.constant 0 : index
      %80 = vector.load %arg2[%c0_89, %c4, %c0_90, %c0_91] : memref<2x7x16x16xf32, #tpu.memory_space<vmem>>, vector<1x1x16x16xf32>
      %81 = vector.shape_cast %80 : vector<1x1x16x16xf32> to vector<16x16xf32>
      %cst_92 = arith.constant dense<0.000000e+00> : vector<16x16xf32>
      %82 = tpu.matmul %79, %81, %cst_92 {dimension_numbers = #tpu.dot_dimension_numbers<[1], [0], [0], [1], [0, 0, 1, 1], [], []>, precision = #tpu.contract_precision<fp32>} : vector<16x16xf32>, vector<16x16xf32>, vector<16x16xf32> -> vector<16x16xf32>
      %83 = arith.addf %71, %82 : vector<16x16xf32>
      %c1_93 = arith.constant 1 : index
      %c9_94 = arith.constant 9 : index
      %c0_95 = arith.constant 0 : index
      %84 = vector.load %arg7[%c1_93, %c9_94, %c0_95] : memref<2x32x16xf32, #tpu.memory_space<vmem>>, vector<1x16x16xf32>
      %85 = vector.shape_cast %84 : vector<1x16x16xf32> to vector<16x16xf32>
      %c1_96 = arith.constant 1 : index
      %c4_97 = arith.constant 4 : index
      %c0_98 = arith.constant 0 : index
      %c0_99 = arith.constant 0 : index
      %86 = vector.load %arg2[%c1_96, %c4_97, %c0_98, %c0_99] : memref<2x7x16x16xf32, #tpu.memory_space<vmem>>, vector<1x1x16x16xf32>
      %87 = vector.shape_cast %86 : vector<1x1x16x16xf32> to vector<16x16xf32>
      %cst_100 = arith.constant dense<0.000000e+00> : vector<16x16xf32>
      %88 = tpu.matmul %85, %87, %cst_100 {dimension_numbers = #tpu.dot_dimension_numbers<[1], [0], [0], [1], [0, 0, 1, 1], [], []>, precision = #tpu.contract_precision<fp32>} : vector<16x16xf32>, vector<16x16xf32>, vector<16x16xf32> -> vector<16x16xf32>
      %89 = arith.addf %77, %88 : vector<16x16xf32>
      %c0_101 = arith.constant 0 : index
      %c10 = arith.constant 10 : index
      %c0_102 = arith.constant 0 : index
      %90 = vector.load %arg7[%c0_101, %c10, %c0_102] : memref<2x32x16xf32, #tpu.memory_space<vmem>>, vector<1x16x16xf32>
      %91 = vector.shape_cast %90 : vector<1x16x16xf32> to vector<16x16xf32>
      %c0_103 = arith.constant 0 : index
      %c5_104 = arith.constant 5 : index
      %c0_105 = arith.constant 0 : index
      %c0_106 = arith.constant 0 : index
      %92 = vector.load %arg2[%c0_103, %c5_104, %c0_105, %c0_106] : memref<2x7x16x16xf32, #tpu.memory_space<vmem>>, vector<1x1x16x16xf32>
      %93 = vector.shape_cast %92 : vector<1x1x16x16xf32> to vector<16x16xf32>
      %cst_107 = arith.constant dense<0.000000e+00> : vector<16x16xf32>
      %94 = tpu.matmul %91, %93, %cst_107 {dimension_numbers = #tpu.dot_dimension_numbers<[1], [0], [0], [1], [0, 0, 1, 1], [], []>, precision = #tpu.contract_precision<fp32>} : vector<16x16xf32>, vector<16x16xf32>, vector<16x16xf32> -> vector<16x16xf32>
      %95 = arith.addf %83, %94 : vector<16x16xf32>
      %c1_108 = arith.constant 1 : index
      %c10_109 = arith.constant 10 : index
      %c0_110 = arith.constant 0 : index
      %96 = vector.load %arg7[%c1_108, %c10_109, %c0_110] : memref<2x32x16xf32, #tpu.memory_space<vmem>>, vector<1x16x16xf32>
      %97 = vector.shape_cast %96 : vector<1x16x16xf32> to vector<16x16xf32>
      %c1_111 = arith.constant 1 : index
      %c5_112 = arith.constant 5 : index
      %c0_113 = arith.constant 0 : index
      %c0_114 = arith.constant 0 : index
      %98 = vector.load %arg2[%c1_111, %c5_112, %c0_113, %c0_114] : memref<2x7x16x16xf32, #tpu.memory_space<vmem>>, vector<1x1x16x16xf32>
      %99 = vector.shape_cast %98 : vector<1x1x16x16xf32> to vector<16x16xf32>
      %cst_115 = arith.constant dense<0.000000e+00> : vector<16x16xf32>
      %100 = tpu.matmul %97, %99, %cst_115 {dimension_numbers = #tpu.dot_dimension_numbers<[1], [0], [0], [1], [0, 0, 1, 1], [], []>, precision = #tpu.contract_precision<fp32>} : vector<16x16xf32>, vector<16x16xf32>, vector<16x16xf32> -> vector<16x16xf32>
      %101 = arith.addf %89, %100 : vector<16x16xf32>
      %c0_116 = arith.constant 0 : index
      %c11 = arith.constant 11 : index
      %c0_117 = arith.constant 0 : index
      %102 = vector.load %arg7[%c0_116, %c11, %c0_117] : memref<2x32x16xf32, #tpu.memory_space<vmem>>, vector<1x16x16xf32>
      %103 = vector.shape_cast %102 : vector<1x16x16xf32> to vector<16x16xf32>
      %c0_118 = arith.constant 0 : index
      %c6_119 = arith.constant 6 : index
      %c0_120 = arith.constant 0 : index
      %c0_121 = arith.constant 0 : index
      %104 = vector.load %arg2[%c0_118, %c6_119, %c0_120, %c0_121] : memref<2x7x16x16xf32, #tpu.memory_space<vmem>>, vector<1x1x16x16xf32>
      %105 = vector.shape_cast %104 : vector<1x1x16x16xf32> to vector<16x16xf32>
      %cst_122 = arith.constant dense<0.000000e+00> : vector<16x16xf32>
      %106 = tpu.matmul %103, %105, %cst_122 {dimension_numbers = #tpu.dot_dimension_numbers<[1], [0], [0], [1], [0, 0, 1, 1], [], []>, precision = #tpu.contract_precision<fp32>} : vector<16x16xf32>, vector<16x16xf32>, vector<16x16xf32> -> vector<16x16xf32>
      %107 = arith.addf %95, %106 : vector<16x16xf32>
      %c1_123 = arith.constant 1 : index
      %c11_124 = arith.constant 11 : index
      %c0_125 = arith.constant 0 : index
      %108 = vector.load %arg7[%c1_123, %c11_124, %c0_125] : memref<2x32x16xf32, #tpu.memory_space<vmem>>, vector<1x16x16xf32>
      %109 = vector.shape_cast %108 : vector<1x16x16xf32> to vector<16x16xf32>
      %c1_126 = arith.constant 1 : index
      %c6_127 = arith.constant 6 : index
      %c0_128 = arith.constant 0 : index
      %c0_129 = arith.constant 0 : index
      %110 = vector.load %arg2[%c1_126, %c6_127, %c0_128, %c0_129] : memref<2x7x16x16xf32, #tpu.memory_space<vmem>>, vector<1x1x16x16xf32>
      %111 = vector.shape_cast %110 : vector<1x1x16x16xf32> to vector<16x16xf32>
      %cst_130 = arith.constant dense<0.000000e+00> : vector<16x16xf32>
      %112 = tpu.matmul %109, %111, %cst_130 {dimension_numbers = #tpu.dot_dimension_numbers<[1], [0], [0], [1], [0, 0, 1, 1], [], []>, precision = #tpu.contract_precision<fp32>} : vector<16x16xf32>, vector<16x16xf32>, vector<16x16xf32> -> vector<16x16xf32>
      %113 = arith.addf %101, %112 : vector<16x16xf32>
      %114 = arith.addf %107, %113 : vector<16x16xf32>
      %115 = arith.negf %114 : vector<16x16xf32>
      %116 = math.exp %115 : vector<16x16xf32>
      %cst_131 = arith.constant 1.000000e+00 : f32
      %117 = vector.broadcast %cst_131 : f32 to vector<16x16xf32>
      %118 = arith.addf %117, %116 : vector<16x16xf32>
      %119 = arith.divf %117, %118 : vector<16x16xf32>
      %c0_132 = arith.constant 0 : index
      %c0_133 = arith.constant 0 : index
      %c0_134 = arith.constant 0 : index
      %c0_135 = arith.constant 0 : index
      %120 = vector.load %arg4[%c0_132, %c0_133, %c0_134, %c0_135] : memref<1x1x16x16xf32, #tpu.memory_space<vmem>>, vector<1x1x16x16xf32>
      %121 = vector.shape_cast %120 : vector<1x1x16x16xf32> to vector<16x16xf32>
      %122 = vector.shape_cast %119 : vector<16x16xf32> to vector<1x1x16x16xf32>
      tpu.vector_store %arg4[%c0_132, %c0_133, %c0_134, %c0_135], %122 {strides = array<i32>} : memref<1x1x16x16xf32, #tpu.memory_space<vmem>>, vector<1x1x16x16xf32>,
    } else {
    }
    return
  }
  func.func @transform_0(%arg0: i32, %arg1: i32) -> (i32, i32, i32, i32) {
    %c0_i32 = arith.constant 0 : i32
    %c0_i32_0 = arith.constant 0 : i32
    %c0_i32_1 = arith.constant 0 : i32
    %c0_i32_2 = arith.constant 0 : i32
    %c0_i32_3 = arith.constant 0 : i32
    return %c0_i32, %c0_i32_0, %c0_i32_1, %c0_i32_2 : i32, i32, i32, i32
  }
  func.func @transform_1(%arg0: i32, %arg1: i32) -> (i32, i32, i32, i32) {
    %c0_i32 = arith.constant 0 : i32
    %c0_i32_0 = arith.constant 0 : i32
    %c0_i32_1 = arith.constant 0 : i32
    return %arg0, %arg1, %c0_i32, %c0_i32_0 : i32, i32, i32, i32
  }
  func.func @transform_2(%arg0: i32, %arg1: i32) -> (i32, i32, i32, i32) {
    %c0_i32 = arith.constant 0 : i32
    %c0_i32_0 = arith.constant 0 : i32
    %c0_i32_1 = arith.constant 0 : i32
    %c0_i32_2 = arith.constant 0 : i32
    return %arg0, %c0_i32, %c0_i32_0, %c0_i32_1 : i32, i32, i32, i32
  }
}

</mosaic_0001>

<bundles_post_ra>
// kernel: tpu_custom_call.1
= control target key start
LH: loop header
LB: loop body
LE: loop exit
PB: predicated region body
PF: predicated region fallthrough
CT: control target
= control target key end

     0   :  { %s10112_s0 = inlined_call_operand.hbm [shape: f32[2,7,16,16], index: 0, kind: input, shape index: {}]   ;;  %s10113_s1 = inlined_call_operand.hbm [shape: f32[2,4,16,16], index: 1, kind: input, shape index: {}]   ;;  %s10114_s2 = inlined_call_operand.hbm [shape: f32[2,1,16,16], index: 2, kind: output, shape index: {}]  }
   0x1   :  { %10124 = sst [smem:[#allocation32_spill]] %s10112_s0 }
   0x2   :  { %10125 = sst [smem:[#allocation33_spill]] %s10114_s2 }
   0x3   :  { %7 = vsyncpa [#allocation6], 0 }
   0x4   :  { %8 = vsyncpa [#allocation9], 0 }
   0x5   :  { %10 = vsyncpa [#allocation9 + $0x1], 0 }
   0x6   :  { %11 = vsyncpa [#allocation7], 0 }
   0x7   :  { %13 = vsyncpa [#allocation7 + $0x1], 0  ;;  %s8864_s9 = smov 0   ;;  %s8866_s10 = smov 0  }
   0x8   :  { %s8868_s11 = smov 0   ;;  %s8870_s12 = smov 0  }
   0x9   :  { %s8872_s13 = smov 0   ;;  %s8874_s14 = smov 0  }
   0xa   :  { %s8876_s15 = smov 0   ;;  %s8878_s16 = smov 0  }
   0xb   :  { %s8880_s17 = smov 0   ;;  %s8882_s18 = smov 0  }
   0xc   :  { %s8884_s19 = smov 0  }
   0xd LB: > { %10126 = sst [smem:[#allocation14_spill]] %s8799_s9  ;;  %s7585_s20 = sadd.s32 4294967295, %s8839_s19   ;;  %s8839_s19 = sphi %s8884_s19, %s19_s19   ;;  %s8835_s18 = sphi %s8882_s18, %s10184_s18   ;;  %s8831_s17 = sphi %s8880_s17, %s10183_s17   ;;  %s8827_s16 = sphi %s8878_s16, %s10182_s16   ;;  %s8823_s15 = sphi %s8876_s15, %s10181_s15   ;;  %s8819_s14 = sphi %s8874_s14, %s10180_s14   ;;  %s8815_s13 = sphi %s8872_s13, %s10179_s13   ;;  %s8811_s12 = sphi %s8870_s12, %s10178_s12   ;;  %s8807_s11 = sphi %s8868_s11, %s10177_s11   ;;  %s8803_s10 = sphi %s8866_s10, %s10176_s10   ;;  %s8799_s9 = sphi %s8864_s9, %s10175_s9  }
   0xe   : > { %s7586_s21 = sadd.s32 4294967294, %s8839_s19   ;;  %p74_p0 = scmp.ne.s32.totalorder %s8815_s13, %s8811_s12 }
   0xf   : > { %p8920_p1 = scmp.eq.s32.totalorder %s7585_s20, 0  ;;  %s87_s23 = sadd.s32 1, %s8807_s11 }
  0x10   : > { %p97_p2 = scmp.ne.s32.totalorder %s8807_s11, %s8803_s10  ;;  %p98_p4 = scmp.eq.s32.totalorder %s7585_s20, 3 }
  0x11   : > { %p8929_p3 = por %p8920_p1, %p74_p0  ;;  %p103_p5 = scmp.ne.s32.totalorder %s8803_s10, %s8799_s9 }
  0x12   : > { %p104_p6 = scmp.eq.s32.totalorder %s7586_s21, 3  ;;  %p8935_p7 = por %p98_p4, %p97_p2 }
  0x13   : > { %p7587_p8 = scmp.ge.s32.totalorder %s8839_s19, 1  ;;  %p111_p10 = scmp.lt.s32.totalorder %s8839_s19, 5 }
  0x14   : > { %s10129_s25 = scalar_select %p8935_p7, 1, 0 }
  0x15   : > { %p8940_p9 = por %p104_p6, %p103_p5  ;;  %p8945_p11 = pnand %p7587_p8, %p111_p10 }
  0x16   : > { %10130 = sst [smem:[#allocation15_spill]] %s10129_s25  ;;  %s8841_s28 = smov [#allocation5]  }
  0x17   : > { %s10131_s26 = scalar_select %p8940_p9, 1, 0 }
  0x18   : > { %s123_s29 = sshll.u32 %s8841_s28, 4  ;;  %p8543_p12 = pneg %p8945_p11  ;;  %s124_s29 = int_to_ptr.vmem [resolvable:$true] %s123_s29 }
  0x19   : > { %10132 = sst [smem:[#allocation16_spill]] %s10131_s26  ;;  %s8672_s30 = scalar_lea.vmem %s124_s29, 3584 }
  0x1a   : > { %p8544_p13 = pnand %p8543_p12, %p8920_p1  ;;  %p8673_p2 = scmp.ne.s32.totalorder %s124_s29, %s8672_s30 }
  0x1b   : > { %p8680_p6 = scmp.lt.s32.totalorder %s124_s29, %s124_s29  ;;  %p8681_p9 = scmp.lt.s32.totalorder %s8672_s30, %s8672_s30 }
  0x1c   : > { %p8663_p0 = pneg %p8544_p13 }
  0x1d   : > { %p8682_p7 = por %p8681_p9, %p8680_p6 }
  0x1e   : > { %p8675_p4 = pnand %p8673_p2, %p8663_p0 }
  0x20   : > { %p8676_p5 = pneg %p8675_p4 }
  0x22   : > { %p8683_p8 = pnand %p8682_p7, %p8676_p5 }
  0x24   : > { %8686 = shalt.err (!%p8683_p8)
}
  0x25   : > { %s10116_s3 = smov 128   ;;  %s10117_s4 = smov 8  }
  0x26   : > { %s10134_s0 = sld [smem:[#allocation32_spill]]  ;;  %s28_s7 = sadd.s32 1, %s8831_s17 }
  0x27   : > { %p29_p7 = scmp.ge.s32.totalorder %s28_s7, 2  ;;  %s31_s8 = sadd.s32 1, %s8835_s18 }
  0x28   : > { %s61_s12 = sadd.s32 1, %s8819_s14  ;;  %p68_p9 = scmp.ne.s32.totalorder %s8819_s14, %s8815_s13 }
  0x29   : > { %s10186_s7 = smov (%p29_p7, %s28_s7), 0  ;;  %s10188_s8 = smov (!%p29_p7, %s31_s8), %s8835_s18 }
  0x2a   : > { %10135 = sst [smem:[#allocation17_spill]] %s10186_s7  ;;  %s57_s20 = ssub.s32 %s8831_s17, %s10186_s7 }
  0x2b   : > { %p69_p10 = scmp.eq.s32.totalorder %s8839_s19, 0  ;;  %p33_p12 = scmp.ge.s32.totalorder %s10188_s8, 2 }
  0x2c   : > { %8546 = dma.hbm_to_vmem [thread:$0]  (!%p8544_p13), %s10134_s0, 3584, %s124_s29, [#allocation6], %s10116_s3, %s10116_s3, %s10117_s4  }
  0x2d   : > { %p8556_p0 = scmp.lt.s32.totalorder %s8839_s19, 4  ;;  %p8971_p13 = por %p69_p10, %p68_p9 }
  0x2e   : > { %s137_s28 = sand.u32 1, %s8819_s14   ;;  %s10190_s8 = smov (%p33_p12, %s10188_s8), 0 }
  0x2f   : > { %s7590_s29 = sshll.u32 %s137_s28, 5  ;;  %s56_s30 = ssub.s32 %s8835_s18, %s10190_s8 }
  0x30   : > { %s58_s5 = sor.u32 %s57_s20, %s56_s30  ;;  %p85_p2 = scmp.eq.s32.totalorder %s56_s30, 0 }
  0x31   : > { %p59_p4 = scmp.eq.s32.totalorder %s58_s5, 0  ;;  %s7609_s6 = sshll.u32 %s8831_s17, 2 }
  0x32   : > { %s8984_s3 = scalar_select %p85_p2, %s8807_s11, %s87_s23  }
  0x33   : > { %s8987_s4 = scalar_select %p59_p4, %s8819_s14, %s61_s12  }
  0x34   : > { %s7593_s0 = sshll.u32 %s8835_s18, 3  ;;  %s141_s7 = scalar_lea.vmem [#allocation8], %s7590_s29 }
  0x35   : > { %s151_s26 = sshll.u32 %s141_s7, 4  ;;  %s148_s9 = sadd.s32 %s7609_s6, %s7593_s0  ;;  %s152_s26 = int_to_ptr.vmem [resolvable:$true] %s151_s26 }
  0x36   : > { %s7594_s2 = sshll.u32 %s148_s9, 7  ;;  %p8994_p5 = pnand %p8556_p0, %p8971_p13 }
  0x37   : > { %s150_s23 = scalar_lea.hbm %s10113_s1, %s7594_s2  ;;  %s138_s5 = scalar_lea.sflag [#allocation9], %s137_s28 }
  0x38   : > { %p8689_p6 = pneg %p8994_p5  ;;  %s8700_s12 = scalar_lea.vmem %s152_s26, 512 }
  0x39   : > { %p8701_p8 = scmp.ne.s32.totalorder %s152_s26, %s8700_s12  ;;  %s8844_s0 = smov [#allocation8]  }
  0x3a   : > { %s8705_s9 = sshll.u32 %s8844_s0, 4  ;;  %s8706_s9 = int_to_ptr.vmem [resolvable:$false] %s8705_s9 }
  0x3b   : > { %p8703_p7 = pnand %p8701_p8, %p8689_p6  ;;  %s8707_s7 = scalar_lea.vmem %s8706_s9, 1024 }
  0x3c   : > { %p8708_p10 = scmp.lt.s32.totalorder %s152_s26, %s8706_s9  ;;  %p8709_p12 = scmp.lt.s32.totalorder %s8707_s7, %s8700_s12 }
  0x3d   : > { %p8704_p9 = pneg %p8703_p7 }
  0x3e   : > { %p8710_p0 = por %p8709_p12, %p8708_p10 }
  0x40   : > { %p8711_p13 = pnand %p8710_p0, %p8704_p9 }
  0x42   : > { %8714 = shalt.err (!%p8711_p13)
}
  0x43   : > { %s10138_s21 = smov 8   ;;  %s10139_s2 = smov 128  }
  0x44   : > { %8550 = dma.hbm_to_vmem [thread:$0]  (!%p8994_p5), %s150_s23, 512, %s152_s26, %s138_s5, %s10139_s2, %s10139_s2, %s10138_s21  }
  0x45   : > { %163 = sbr.rel (%p8945_p11) target bundleno = 632 (0x278), region = 28 }
  0x4a   : > { %8786 = dma.done.wait (%p8920_p1), [#allocation6], 3584  }
  0x4b   : > { %8788 = vsyncadd (%p8920_p1), [#allocation6], 4294963712  ;;  %s169_s28 = sand.u32 1, %s8815_s13  }
  0x4c   : > { %s7597_s29 = sshll.u32 %s169_s28, 5  ;;  %s170_s6 = scalar_lea.sflag [#allocation9], %s169_s28 }
  0x4d   : > { %s173_s20 = scalar_lea.vmem [#allocation8], %s7597_s29 }
  0x4e   : > { %8790 = dma.done.wait (%p8929_p3), %s170_s6, 512  }
  0x4f   : > { %8792 = vsyncadd (%p8929_p3), %s170_s6, 4294966784  ;;  %s191_s25 = sand.u32 1, %s8803_s10   ;;  %vm199_vm0 = vcmask 130048   ;;  %v195_v0 = vld [vmem:[%s173_s20] sm:$0xff]  ;;  %v196_v1 = vld [vmem:[%s173_s20 + $0x8] sm:$0xff]  ;;  %p7599_p1 = scmp.ne.s32.totalorder %s8823_s15, 0 }
  0x50   : > { %s7598_s26 = sshll.u32 %s191_s25, 4  ;;  %v197_v2 = vld [vmem:[%s173_s20 + $0x10] sm:$0xff]  ;;  %v198_v3 = vld [vmem:[%s173_s20 + $0x18] sm:$0xff]  ;;  %v200_v4 = vsel %vm199_vm0, %v195_v0, 0.0  ;;  %v203_v6 = vsel %vm199_vm0, %v196_v1, 0.0  ;;  %v206_v7 = vsel %vm199_vm0, %v195_v0, -inf }
  0x51   : > { %v201_v5 = vsel %vm199_vm0, %v197_v2, 0.0  ;;  %v204_v9 = vsel %vm199_vm0, %v198_v3, 0.0  ;;  %v207_v10 = vsel %vm199_vm0, %v197_v2, -inf  ;;  %v209_v11 = vsel %vm199_vm0, %v196_v1, -inf  ;;  %s9030_s22 = scalar_lea.vmem [#allocation10], %s7598_s26  ;;  %215 = sbr.rel (%p7599_p1) target bundleno = 88 (0x58), region = 40 }
  0x52   : > { %v202_v8 = vadd.f32 %v201_v5, %v200_v4  ;;  %v205_v12 = vadd.f32 %v204_v9, %v203_v6  ;;  %v208_v13 = vmax.f32 %v206_v7, %v207_v10  ;;  %v210_v14 = vsel %vm199_vm0, %v198_v3, -inf }
  0x53   : > { %v211_v15 = vmax.f32 %v209_v11, %v210_v14 }
  0x56   : > { %216 = vst.msk [vmem:[#allocation2] sm:$0xff] %vm199_vm0, %v202_v8  ;;  %217 = vst.msk [vmem:[#allocation2 + $0x8] sm:$0xff] %vm199_vm0, %v205_v12 }
  0x57   : > { %218 = vst.msk [vmem:[#allocation3] sm:$0xff] %vm199_vm0, %v208_v13  ;;  %219 = vst.msk [vmem:[#allocation3 + $0x8] sm:$0xff] %vm199_vm0, %v211_v15 }
  0x58 PF: > { %p7600_p3 = scmp.le.s32.totalorder %s8823_s15, 0 }
  0x5a   : > { %223 = sbr.rel (%p7600_p3) target bundleno = 100 (0x64), region = 44 }
  0x5f   : > { %v224_v16 = vld [vmem:[#allocation2] sm:$0xff]  ;;  %v225_v17 = vld [vmem:[#allocation2 + $0x8] sm:$0xff]  ;;  %v230_v18 = vld [vmem:[#allocation3] sm:$0xff] }
  0x60   : > { %v226_v19 = vadd.f32 %v224_v16, %v202_v8  ;;  %v227_v20 = vadd.f32 %v225_v17, %v205_v12  ;;  %v232_v21 = vmax.f32 %v230_v18, %v208_v13  ;;  %v231_v22 = vld [vmem:[#allocation3 + $0x8] sm:$0xff] }
  0x61   : > { %v233_v23 = vmax.f32 %v231_v22, %v211_v15 }
  0x62   : > { %228 = vst.msk [vmem:[#allocation2] sm:$0xff] %vm199_vm0, %v226_v19  ;;  %229 = vst.msk [vmem:[#allocation2 + $0x8] sm:$0xff] %vm199_vm0, %v227_v20 }
  0x63   : > { %234 = vst.msk [vmem:[#allocation3] sm:$0xff] %vm199_vm0, %v232_v21  ;;  %235 = vst.msk [vmem:[#allocation3 + $0x8] sm:$0xff] %vm199_vm0, %v233_v23 }
  0x64 PF: > { %p7601_p11 = scmp.ne.s32.totalorder %s8823_s15, 1 }
  0x66   : > { %239 = sbr.rel (%p7601_p11) target bundleno = 605 (0x25d), region = 48 }
  0x6b   : > { %v268_v24 = vld [vmem:[#allocation5 + $0x18] sm:$0xff]  ;;  %v267_v25 = vld [vmem:[#allocation5 + $0x10] sm:$0xff]  ;;  %v244_v26 = vld [vmem:[#allocation2] sm:$0xff]  ;;  %v8845_v29 = vmov 0.0  }
  0x6c   : > { %v9043_v27 = vand.u32 4294901760, %v268_v24  ;;  %v9045_v28 = vand.u32 4294901760, %v267_v25  ;;  %240 = vst.msk [vmem:[#allocation4] sm:$0xff] %vm199_vm0, %v8845_v29  ;;  %v246_v30 = vmul.f32 0.25, %v244_v26  ;;  %241 = vst.msk [vmem:[#allocation4 + $0x20] sm:$0xff] %vm199_vm0, %v8845_v29  ;;  %v245_v31 = vld [vmem:[#allocation2 + $0x8] sm:$0xff] }
  0x6d   : > { %242 = vst.msk [vmem:[#allocation4 + $0x18] sm:$0xff] %vm199_vm0, %v8845_v29  ;;  %243 = vst.msk [vmem:[#allocation4 + $0x38] sm:$0xff] %vm199_vm0, %v8845_v29  ;;  %v247_v32 = vmul.f32 0.25, %v245_v31  ;;  %v258_v33 = vld [vmem:[#allocation5 + $0x8] sm:$0xff]  ;;  %v250_v34 = vld [vmem:[#allocation3] sm:$0xff] }
  0x6e   : > { %7947 = vmatprep.subr.mxu0 %v9043_v27  ;;  %v9053_v35 = vsub.f32 %v268_v24, %v9043_v27  ;;  %v9056_v36 = vsub.f32 %v267_v25, %v9045_v28  ;;  %248 = vst.msk [vmem:[#allocation4 + $0x8] sm:$0xff] %vm199_vm0, %v246_v30  ;;  %253 = vst.msk [vmem:[#allocation4 + $0x28] sm:$0xff] %vm199_vm0, %v250_v34  ;;  %v251_v37 = vld [vmem:[#allocation3 + $0x8] sm:$0xff]  ;;  %v9070_v40 = vand.u32 4294901760, %v258_v33  ;;  %v257_v41 = vld [vmem:[#allocation5] sm:$0xff] }
  0x6f   : > { %7948 = vmatpush3.msra.mxu0 %v9043_v27  ;;  %249 = vst.msk [vmem:[#allocation4 + $0x10] sm:$0xff] %vm199_vm0, %v247_v32  ;;  %254 = vst.msk [vmem:[#allocation4 + $0x30] sm:$0xff] %vm199_vm0, %v251_v37  ;;  %v9081_v47 = vand.u32 4294901760, %v257_v41  ;;  %v1289_v16 = vld [vmem:[#allocation5 + $0x88] sm:$0xff]  ;;  %v1288_v19 = vld [vmem:[#allocation5 + $0x80] sm:$0xff] }
  0x70   : > { %v9064_v38 = vand.u32 4294901760, %v9053_v35  ;;  %7949 = vmatprep.subr.mxu0 %v9045_v28  ;;  %v9068_v39 = vand.u32 4294901760, %v9056_v36  ;;  %v9079_v46 = vsub.f32 %v258_v33, %v9070_v40  ;;  %v9134_v22 = vand.u32 4294901760, %v1289_v16 }
  0x71   : > { %7950 = vmatpush3.msra.mxu0 %v9045_v28  ;;  %v9095_v60 = vsub.f32 %v257_v41, %v9081_v47  ;;  %v9139_v24 = vand.u32 4294901760, %v1288_v19  ;;  %v263_v41 = vld [vmem:[#allocation5 + $0x78] sm:$0xff] }
  0x72   : > { %v394_v42 = vsub.f32 %v9053_v35, %v9064_v38  ;;  %v401_v43 = vsub.f32 %v9056_v36, %v9068_v39  ;;  %7961 = vmatprep.subr.mxu0 %v9053_v35  ;;  %v9092_v59 = vand.u32 4294901760, %v9079_v46 }
  0x73   : > { %v9110_v4 = vand.u32 4294901760, %v9095_v60  ;;  %v9157_v30 = vsub.f32 %v1288_v19, %v9139_v24 }
  0x74   : > { %v395_v44 = vand.u32 4294901760, %v394_v42  ;;  %v402_v45 = vand.u32 4294901760, %v401_v43  ;;  %v902_v3 = vsub.f32 %v9079_v46, %v9092_v59 }
  0x75   : > { %v264_v48 = vld [vmem:[#allocation4 + $0x6] sm:$0xff]  ;;  %v909_v12 = vsub.f32 %v9095_v60, %v9110_v4  ;;  %v9176_v34 = vand.u32 4294901760, %v9157_v30 }
  0x76   : > { %v255_v49 = vld [vmem:[#allocation4 + $0x5] sm:$0xff]  ;;  %7954 = vmatprep.subr.mxu1 %v395_v44  ;;  %v270_v50 = vsel %vm199_vm0, %v264_v48, 0  ;;  %v265_v51 = vld [vmem:[#allocation4 + $0xe] sm:$0xff]  ;;  %v903_v11 = vand.u32 4294901760, %v902_v3  ;;  %v9202_v48 = vand.u32 4294901760, %v263_v41 }
  0x77   : > { %v778_v52 = vsel %vm199_vm0, %v255_v49, 0  ;;  %v256_v53 = vld [vmem:[#allocation4 + $0xd] sm:$0xff]  ;;  %7955 = vmatpush3.msra.mxu1 %v395_v44  ;;  %v342_v54 = vand.u32 4294901760, %v270_v50  ;;  %v273_v55 = vsel %vm199_vm0, %v265_v51, 0  ;;  %v910_v15 = vand.u32 4294901760, %v909_v12  ;;  %v259_v42 = vld [vmem:[#allocation4 + $0x25] sm:$0xff] }
  0x78   : > { %v9086_v56 = vand.u32 4294901760, %v778_v52  ;;  %v781_v57 = vsel %vm199_vm0, %v256_v53, 0  ;;  %7956 = vmatprep.subr.mxu1 %v402_v45  ;;  %v9089_v58 = vand.u32 4294901760, %v273_v55  ;;  %v1285_v17 = vld [vmem:[#allocation4 + $0x26] sm:$0xff]  ;;  %v1286_v20 = vld [vmem:[#allocation4 + $0x2e] sm:$0xff]  ;;  %v1799_v49 = vsel %vm199_vm0, %v259_v42, 0 }
  0x79   : > { %v343_v61 = vsub.f32 %v270_v50, %v342_v54  ;;  %7957 = vmatpush3.msra.mxu1 %v402_v45  ;;  %7958 = vmatprep.mubr.f32.mxu1 %v342_v54  ;;  %v9100_v63 = vand.u32 4294901760, %v781_v57  ;;  %v1291_v23 = vsel %vm199_vm0, %v1285_v17, 0  ;;  %v1294_v25 = vsel %vm199_vm0, %v1286_v20, 0  ;;  %v262_v45 = vld [vmem:[#allocation5 + $0x70] sm:$0xff]  ;;  %v2306_v3 = vld [vmem:[#allocation4 + $0x7] sm:$0xff] }
  0x7a   : > { %v353_v62 = vsub.f32 %v273_v55, %v9089_v58  ;;  %7959 = vmatmul.mubr.f32.vlgmr.msra.gmra.mxu1 %v9089_v58  ;;  %7968 = vmatprep.subr.mxu1 %v9043_v27  ;;  %v9104_v1 = vsub.f32 %v778_v52, %v9086_v56  ;;  %v9152_v29 = vand.u32 4294901760, %v1294_v25  ;;  %v9212_v53 = vand.u32 4294901760, %v1799_v49 }
  0x7b   : > { %v344_v0 = vand.u32 4294901760, %v343_v61  ;;  %7969 = vmatpush3.msra.mxu1 %v9043_v27  ;;  %v9115_v7 = vsub.f32 %v781_v57, %v9100_v63 }
  0x7c   : > { %v354_v2 = vand.u32 4294901760, %v353_v62  ;;  %7970 = vmatprep.subr.mxu1 %v9045_v28  ;;  %v852_v9 = vand.u32 4294901760, %v9104_v1  ;;  %v9171_v33 = vsub.f32 %v1294_v25, %v9152_v29  ;;  %v9227_v57 = vsub.f32 %v1799_v49, %v9212_v53 }
  0x7d   : > { %v345_v5 = vsub.f32 %v343_v61, %v344_v0  ;;  %7971 = vmatpush3.msra.mxu1 %v9045_v28  ;;  %7972 = vmatprep.mubr.f32.mxu1 %v344_v0  ;;  %v862_v13 = vand.u32 4294901760, %v9115_v7 }
  0x7e   : > { %v355_v6 = vsub.f32 %v353_v62, %v354_v2  ;;  %7973 = vmatmul.mubr.f32.vlgmr.msra.gmra.mxu1 %v354_v2  ;;  %7982 = vmatprep.subr.mxu1 %v9043_v27  ;;  %v853_v14 = vsub.f32 %v9104_v1, %v852_v9  ;;  %v1375_v37 = vand.u32 4294901760, %v9171_v33  ;;  %v2310_v2 = vld [vmem:[#allocation5 + $0x28] sm:$0xff] }
  0x7f   : > { %v346_v8 = vand.u32 4294901760, %v345_v5  ;;  %7983 = vmatpush3.msra.mxu1 %v9043_v27  ;;  %7986 = vmatprep.mubr.f32.mxu1 %v342_v54  ;;  %v863_v18 = vsub.f32 %v9115_v7, %v862_v13  ;;  %v9144_v27 = vand.u32 4294901760, %v1291_v23 }
  0x80   : > { %v356_v10 = vand.u32 4294901760, %v355_v6  ;;  %7984 = vmatprep.subr.mxu1 %v9045_v28  ;;  %v854_v21 = vand.u32 4294901760, %v853_v14  ;;  %v1376_v44 = vsub.f32 %v9171_v33, %v1375_v37  ;;  %v2309_v6 = vld [vmem:[#allocation5 + $0x20] sm:$0xff] }
  0x81   : > { %7951 = vmatprep.mubr.f32.mxu0 %v346_v8  ;;  %7985 = vmatpush3.msra.mxu1 %v9045_v28  ;;  %v864_v26 = vand.u32 4294901760, %v863_v18  ;;  %v9148_v28 = vsub.f32 %v1289_v16, %v9134_v22  ;;  %v9161_v31 = vsub.f32 %v1291_v23, %v9144_v27  ;;  %v9272_v12 = vand.u32 4294901760, %v2309_v6 }
  0x82   : > { %7952 = vmatmul.mubr.f32.vlgmr.msra.gmra.mxu0 %v356_v10  ;;  %7987 = vmatmul.mubr.f32.vlgmr.msra.gmra.mxu1 %v9089_v58  ;;  %v1377_v52 = vand.u32 4294901760, %v1376_v44  ;;  %v2312_v10 = vsel %vm199_vm0, %v2306_v3, 0 }
  0x83   : > { %7962 = vmatpush3.msra.mxu0 %v9053_v35  ;;  %7965 = vmatprep.mubr.f32.mxu0 %v343_v61  ;;  %v9166_v32 = vand.u32 4294901760, %v9148_v28  ;;  %v1365_v35 = vand.u32 4294901760, %v9161_v31  ;;  %v1873_v61 = vand.u32 4294901760, %v9227_v57  ;;  %v9287_v18 = vsub.f32 %v2309_v6, %v9272_v12 }
  0x84   : > { %7963 = vmatprep.subr.mxu0 %v9056_v36  ;;  %7996 = vmatprep.subr.mxu1 %v903_v11 }
  0x85   : > { %7964 = vmatpush3.msra.mxu0 %v9056_v36  ;;  %7997 = vmatpush3.msra.mxu1 %v903_v11  ;;  %v1415_v36 = vsub.f32 %v9148_v28, %v9166_v32 }
  0x86   : > { %7975 = vmatprep.subr.mxu0 %v9064_v38  ;;  %7966 = vmatmul.mubr.f32.vlgmr.msra.gmra.mxu0 %v353_v62 }
  0x87   : > { %7976 = vmatpush3.msra.mxu0 %v9064_v38  ;;  %7979 = vmatprep.mubr.f32.mxu0 %v342_v54  ;;  %v1422_v38 = vsub.f32 %v9157_v30, %v9176_v34  ;;  %v1416_v43 = vand.u32 4294901760, %v1415_v36  ;;  %v9216_v54 = vsub.f32 %v263_v41, %v9202_v48 }
  0x88   : > { %7977 = vmatprep.subr.mxu0 %v9068_v39  ;;  %7998 = vmatprep.subr.mxu1 %v910_v15 }
  0x89   : > { %7978 = vmatpush3.msra.mxu0 %v9068_v39  ;;  %7999 = vmatpush3.msra.mxu1 %v910_v15  ;;  %v1366_v39 = vsub.f32 %v9161_v31, %v1365_v35  ;;  %v9276_v15 = vand.u32 4294901760, %v2312_v10 }
  0x8a   : > { %7989 = vmatprep.subr.mxu0 %v9070_v40  ;;  %7980 = vmatmul.mubr.f32.vlgmr.msra.gmra.mxu0 %v9089_v58  ;;  %v9232_v58 = vand.u32 4294901760, %v9216_v54 }
  0x8b   : > { %7990 = vmatpush3.msra.mxu0 %v9070_v40  ;;  %7993 = vmatprep.mubr.f32.mxu0 %v854_v21  ;;  %v1367_v50 = vand.u32 4294901760, %v1366_v39  ;;  %v9291_v19 = vsub.f32 %v2312_v10, %v9276_v15 }
  0x8c   : > { %7991 = vmatprep.subr.mxu0 %v9081_v47  ;;  %8000 = vmatprep.mubr.f32.mxu1 %v9086_v56  ;;  %v1923_v62 = vsub.f32 %v9216_v54, %v9232_v58 }
  0x8d   : > { %7992 = vmatpush3.msra.mxu0 %v9081_v47  ;;  %8001 = vmatmul.mubr.f32.vlgmr.msra.gmra.mxu1 %v9100_v63  ;;  %v2386_v23 = vand.u32 4294901760, %v9291_v19 }
  0x8e   : > { %8003 = vmatprep.subr.mxu0 %v9079_v46  ;;  %7994 = vmatmul.mubr.f32.vlgmr.msra.gmra.mxu0 %v864_v26 }
  0x8f   : > { %8004 = vmatpush3.msra.mxu0 %v9079_v46  ;;  %8010 = vmatprep.subr.mxu1 %v9070_v40  ;;  %v260_v46 = vld [vmem:[#allocation4 + $0x2d] sm:$0xff] }
  0x90   : > { %8005 = vmatprep.subr.mxu0 %v9095_v60  ;;  %8011 = vmatpush3.msra.mxu1 %v9070_v40  ;;  %v1802_v51 = vsel %vm199_vm0, %v260_v46, 0 }
  0x91   : > { %8006 = vmatpush3.msra.mxu0 %v9095_v60  ;;  %8012 = vmatprep.subr.mxu1 %v9081_v47  ;;  %v9218_v55 = vand.u32 4294901760, %v1802_v51 }
  0x92   : > { %8007 = vmatprep.mubr.f32.mxu0 %v9104_v1  ;;  %8013 = vmatpush3.msra.mxu1 %v9081_v47  ;;  %v1874_v1 = vsub.f32 %v9227_v57, %v1873_v61 }
  0x93   : > { %8014 = vmatprep.mubr.f32.mxu1 %v852_v9  ;;  %8017 = vmatprep.subr.mxu0 %v9092_v59  ;;  %v9266_v9 = vand.u32 4294901760, %v2310_v2 }
  0x94   : > { %8008 = vmatmul.mubr.f32.vlgmr.msra.gmra.mxu0 %v9115_v7  ;;  %8015 = vmatmul.mubr.f32.vlgmr.msra.gmra.mxu1 %v862_v13  ;;  %v2307_v7 = vld [vmem:[#allocation4 + $0xf] sm:$0xff]  ;;  %v1875_v11 = vand.u32 4294901760, %v1874_v1 }
  0x95   : > { %8018 = vmatpush3.msra.mxu0 %v9092_v59  ;;  %8024 = vmatprep.subr.mxu1 %v9070_v40  ;;  %v9237_v59 = vsub.f32 %v1802_v51, %v9218_v55  ;;  %v2315_v13 = vsel %vm199_vm0, %v2307_v7, 0  ;;  %v9280_v16 = vsub.f32 %v2310_v2, %v9266_v9 }
  0x96   : > { %8019 = vmatprep.subr.mxu0 %v9110_v4  ;;  %8025 = vmatpush3.msra.mxu1 %v9070_v40  ;;  %v1423_v40 = vand.u32 4294901760, %v1422_v38  ;;  %v9282_v17 = vand.u32 4294901760, %v2315_v13 }
  0x97   : > { %8020 = vmatpush3.msra.mxu0 %v9110_v4  ;;  %8026 = vmatprep.subr.mxu1 %v9081_v47  ;;  %v1924_v4 = vand.u32 4294901760, %v1923_v62  ;;  %v9296_v20 = vand.u32 4294901760, %v9280_v16 }
  0x98   : > { %8021 = vmatprep.mubr.f32.mxu0 %v9086_v56  ;;  %8027 = vmatpush3.msra.mxu1 %v9081_v47  ;;  %v9208_v47 = vand.u32 4294901760, %v262_v45  ;;  %v9301_v21 = vsub.f32 %v2315_v13, %v9282_v17 }
  0x99   : > { %8028 = vmatprep.mubr.f32.mxu1 %v9086_v56  ;;  %8031 = vmatprep.subr.mxu0 %v9134_v22 }
  0x9a   : > { %8022 = vmatmul.mubr.f32.vlgmr.msra.gmra.mxu0 %v9100_v63  ;;  %8029 = vmatmul.mubr.f32.vlgmr.msra.gmra.mxu1 %v9100_v63  ;;  %v9223_v56 = vsub.f32 %v262_v45, %v9208_v47  ;;  %v1883_v63 = vand.u32 4294901760, %v9237_v59  ;;  %v2396_v25 = vand.u32 4294901760, %v9301_v21 }
  0x9b   : > { %8032 = vmatpush3.msra.mxu0 %v9134_v22  ;;  %8038 = vmatprep.subr.mxu1 %v1416_v43 }
  0x9c   : > { %8033 = vmatprep.subr.mxu0 %v9139_v24  ;;  %8039 = vmatpush3.msra.mxu1 %v1416_v43  ;;  %v9242_v60 = vand.u32 4294901760, %v9223_v56  ;;  %v1884_v5 = vsub.f32 %v9237_v59, %v1883_v63 }
  0x9d   : > { %8034 = vmatpush3.msra.mxu0 %v9139_v24  ;;  %8040 = vmatprep.subr.mxu1 %v1423_v40 }
  0x9e   : > { %8035 = vmatprep.mubr.f32.mxu0 %v1367_v50  ;;  %8041 = vmatpush3.msra.mxu1 %v1423_v40  ;;  %v1930_v0 = vsub.f32 %v9223_v56, %v9242_v60  ;;  %v1885_v14 = vand.u32 4294901760, %v1884_v5 }
  0x9f   : > { %8042 = vmatprep.mubr.f32.mxu1 %v9144_v27  ;;  %8045 = vmatprep.subr.mxu0 %v9148_v28 }
  0xa0   : > { %8036 = vmatmul.mubr.f32.vlgmr.msra.gmra.mxu0 %v1377_v52  ;;  %8043 = vmatmul.mubr.f32.vlgmr.msra.gmra.mxu1 %v9152_v29  ;;  %v1931_v8 = vand.u32 4294901760, %v1930_v0 }
  0xa1   : > { %8046 = vmatpush3.msra.mxu0 %v9148_v28  ;;  %8052 = vmatprep.subr.mxu1 %v9134_v22  ;;  %v2825_v28 = vld [vmem:[#allocation5 + $0x98] sm:$0xff] }
  0xa2   : > { %8047 = vmatprep.subr.mxu0 %v9157_v30  ;;  %8053 = vmatpush3.msra.mxu1 %v9134_v22 }
  0xa3   : > { %8048 = vmatpush3.msra.mxu0 %v9157_v30  ;;  %8054 = vmatprep.subr.mxu1 %v9139_v24 }
  0xa4   : > { %8049 = vmatprep.mubr.f32.mxu0 %v9161_v31  ;;  %8055 = vmatpush3.msra.mxu1 %v9139_v24  ;;  %v2397_v31 = vsub.f32 %v9301_v21, %v2396_v25 }
  0xa5   : > { %8056 = vmatprep.mubr.f32.mxu1 %v1365_v35  ;;  %8059 = vmatprep.subr.mxu0 %v9166_v32  ;;  %v9330_v35 = vand.u32 4294901760, %v2825_v28 }
  0xa6   : > { %8050 = vmatmul.mubr.f32.vlgmr.msra.gmra.mxu0 %v9171_v33  ;;  %8057 = vmatmul.mubr.f32.vlgmr.msra.gmra.mxu1 %v1375_v37  ;;  %v2822_v33 = vld [vmem:[#allocation4 + $0x2f] sm:$0xff]  ;;  %v2398_v41 = vand.u32 4294901760, %v2397_v31 }
  0xa7   : > { %8060 = vmatpush3.msra.mxu0 %v9166_v32  ;;  %8066 = vmatprep.subr.mxu1 %v9134_v22  ;;  %v2824_v32 = vld [vmem:[#allocation5 + $0x90] sm:$0xff]  ;;  %v2830_v39 = vsel %vm199_vm0, %v2822_v33, 0  ;;  %v9344_v43 = vsub.f32 %v2825_v28, %v9330_v35 }
  0xa8   : > { %8061 = vmatprep.subr.mxu0 %v9176_v34  ;;  %8067 = vmatpush3.msra.mxu1 %v9134_v22  ;;  %v9306_v22 = vand.u32 4294901760, %v9287_v18  ;;  %v9336_v38 = vand.u32 4294901760, %v2824_v32  ;;  %v9346_v44 = vand.u32 4294901760, %v2830_v39 }
  0xa9   : > { %8062 = vmatpush3.msra.mxu0 %v9176_v34  ;;  %8068 = vmatprep.subr.mxu1 %v9139_v24  ;;  %v9360_v40 = vand.u32 4294901760, %v9344_v43 }
  0xaa   : > { %8063 = vmatprep.mubr.f32.mxu0 %v9144_v27  ;;  %8069 = vmatpush3.msra.mxu1 %v9139_v24  ;;  %v2436_v24 = vsub.f32 %v9280_v16, %v9296_v20  ;;  %v2443_v26 = vsub.f32 %v9287_v18, %v9306_v22  ;;  %v9351_v45 = vsub.f32 %v2824_v32, %v9336_v38 }
  0xab   : > { %8070 = vmatprep.mubr.f32.mxu1 %v9144_v27  ;;  %8073 = vmatprep.subr.mxu0 %v9202_v48  ;;  %v2387_v27 = vsub.f32 %v9291_v19, %v2386_v23 }
  0xac   : > { %8064 = vmatmul.mubr.f32.vlgmr.msra.gmra.mxu0 %v9152_v29  ;;  %8071 = vmatmul.mubr.f32.vlgmr.msra.gmra.mxu1 %v9152_v29  ;;  %v2821_v29 = vld [vmem:[#allocation4 + $0x27] sm:$0xff]  ;;  %v2437_v30 = vand.u32 4294901760, %v2436_v24  ;;  %v2444_v34 = vand.u32 4294901760, %v2443_v26  ;;  %v9370_v49 = vand.u32 4294901760, %v9351_v45 }
  0xad   : > { %8074 = vmatpush3.msra.mxu0 %v9202_v48  ;;  %8080 = vmatprep.subr.mxu1 %v1924_v4  ;;  %v2827_v36 = vsel %vm199_vm0, %v2821_v29, 0  ;;  %v2388_v37 = vand.u32 4294901760, %v2387_v27 }
  0xae   : > { %8075 = vmatprep.subr.mxu0 %v9208_v47  ;;  %8081 = vmatpush3.msra.mxu1 %v1924_v4  ;;  %v9340_v42 = vand.u32 4294901760, %v2827_v36  ;;  %v2958_v52 = vsub.f32 %v9351_v45, %v9370_v49 }
  0xaf   : > { %8076 = vmatpush3.msra.mxu0 %v9208_v47  ;;  %8082 = vmatprep.subr.mxu1 %v1931_v8 }
  0xb0   : > { %8077 = vmatprep.mubr.f32.mxu0 %v1875_v11  ;;  %8083 = vmatpush3.msra.mxu1 %v1931_v8  ;;  %v9355_v46 = vsub.f32 %v2827_v36, %v9340_v42 }
  0xb1   : > { %8084 = vmatprep.mubr.f32.mxu1 %v9212_v53  ;;  %8087 = vmatprep.subr.mxu0 %v9216_v54 }
  0xb2   : > { %8078 = vmatmul.mubr.f32.vlgmr.msra.gmra.mxu0 %v1885_v14  ;;  %8085 = vmatmul.mubr.f32.vlgmr.msra.gmra.mxu1 %v9218_v55  ;;  %v2901_v50 = vand.u32 4294901760, %v9355_v46 }
  0xb3   : > { %8088 = vmatpush3.msra.mxu0 %v9216_v54  ;;  %8094 = vmatprep.subr.mxu1 %v9202_v48  ;;  %v3340_v54 = vld [vmem:[#allocation5 + $0x38] sm:$0xff] }
  0xb4   : > { %8089 = vmatprep.subr.mxu0 %v9223_v56  ;;  %8095 = vmatpush3.msra.mxu1 %v9202_v48 }
  0xb5   : > { %8090 = vmatpush3.msra.mxu0 %v9223_v56  ;;  %8096 = vmatprep.subr.mxu1 %v9208_v47 }
  0xb6   : > { %8091 = vmatprep.mubr.f32.mxu0 %v9227_v57  ;;  %8097 = vmatpush3.msra.mxu1 %v9208_v47 }
  0xb7   : > { %8098 = vmatprep.mubr.f32.mxu1 %v1873_v61  ;;  %8101 = vmatprep.subr.mxu0 %v9232_v58  ;;  %v9394_v61 = vand.u32 4294901760, %v3340_v54 }
  0xb8   : > { %8092 = vmatmul.mubr.f32.vlgmr.msra.gmra.mxu0 %v9237_v59  ;;  %8099 = vmatmul.mubr.f32.vlgmr.msra.gmra.mxu1 %v1883_v63  ;;  %v3337_v59 = vld [vmem:[#allocation4 + $0x10] sm:$0xff] }
  0xb9   : > { %8102 = vmatpush3.msra.mxu0 %v9232_v58  ;;  %8108 = vmatprep.subr.mxu1 %v9202_v48  ;;  %v3339_v58 = vld [vmem:[#allocation5 + $0x30] sm:$0xff]  ;;  %v3345_v1 = vsel %vm199_vm0, %v3337_v59, 0  ;;  %v9408_v4 = vsub.f32 %v3340_v54, %v9394_v61 }
  0xba   : > { %8103 = vmatprep.subr.mxu0 %v9242_v60  ;;  %8109 = vmatpush3.msra.mxu1 %v9202_v48  ;;  %v9365_v48 = vsub.f32 %v2830_v39, %v9346_v44  ;;  %v9400_v0 = vand.u32 4294901760, %v3339_v58  ;;  %v9410_v5 = vand.u32 4294901760, %v3345_v1 }
  0xbb   : > { %8104 = vmatpush3.msra.mxu0 %v9242_v60  ;;  %8110 = vmatprep.subr.mxu1 %v9208_v47  ;;  %v2959_v60 = vand.u32 4294901760, %v2958_v52  ;;  %v9424_v8 = vand.u32 4294901760, %v9408_v4 }
  0xbc   : > { %8105 = vmatprep.mubr.f32.mxu0 %v9212_v53  ;;  %8111 = vmatpush3.msra.mxu1 %v9208_v47  ;;  %v2951_v47 = vsub.f32 %v9344_v43, %v9360_v40  ;;  %v2911_v51 = vand.u32 4294901760, %v9365_v48  ;;  %v9415_v6 = vsub.f32 %v3339_v58, %v9400_v0 }
  0xbd   : > { %8112 = vmatprep.mubr.f32.mxu1 %v9212_v53  ;;  %8115 = vmatprep.subr.mxu0 %v9266_v9  ;;  %v2902_v53 = vsub.f32 %v9355_v46, %v2901_v50 }
  0xbe   : > { %8106 = vmatmul.mubr.f32.vlgmr.msra.gmra.mxu0 %v9218_v55  ;;  %8113 = vmatmul.mubr.f32.vlgmr.msra.gmra.mxu1 %v9218_v55  ;;  %v3336_v55 = vld [vmem:[#allocation4 + $0x8] sm:$0xff]  ;;  %v2952_v56 = vand.u32 4294901760, %v2951_v47  ;;  %v2912_v57 = vsub.f32 %v9365_v48, %v2911_v51  ;;  %v9434_v10 = vand.u32 4294901760, %v9415_v6 }
  0xbf   : > { %8116 = vmatpush3.msra.mxu0 %v9266_v9  ;;  %8122 = vmatprep.subr.mxu1 %v2437_v30  ;;  %v3342_v62 = vsel %vm199_vm0, %v3336_v55, 0  ;;  %v2903_v63 = vand.u32 4294901760, %v2902_v53 }
  0xc0   : > { %8117 = vmatprep.subr.mxu0 %v9272_v12  ;;  %8123 = vmatpush3.msra.mxu1 %v2437_v30  ;;  %v2913_v2 = vand.u32 4294901760, %v2912_v57  ;;  %v9404_v3 = vand.u32 4294901760, %v3342_v62  ;;  %v3473_v14 = vsub.f32 %v9415_v6, %v9434_v10 }
  0xc1   : > { %8118 = vmatpush3.msra.mxu0 %v9272_v12  ;;  %8124 = vmatprep.subr.mxu1 %v2444_v34 }
  0xc2   : > { %8119 = vmatprep.mubr.f32.mxu0 %v2388_v37  ;;  %8125 = vmatpush3.msra.mxu1 %v2444_v34  ;;  %v9419_v7 = vsub.f32 %v3342_v62, %v9404_v3 }
  0xc3   : > { %8126 = vmatprep.mubr.f32.mxu1 %v9276_v15  ;;  %8129 = vmatprep.subr.mxu0 %v9280_v16 }
  0xc4   : > { %8120 = vmatmul.mubr.f32.vlgmr.msra.gmra.mxu0 %v2398_v41  ;;  %8127 = vmatmul.mubr.f32.vlgmr.msra.gmra.mxu1 %v9282_v17  ;;  %v3416_v11 = vand.u32 4294901760, %v9419_v7 }
  0xc5   : > { %8130 = vmatpush3.msra.mxu0 %v9280_v16  ;;  %8136 = vmatprep.subr.mxu1 %v9266_v9  ;;  %v3855_v16 = vld [vmem:[#allocation5 + $0xa8] sm:$0xff] }
  0xc6   : > { %8131 = vmatprep.subr.mxu0 %v9287_v18  ;;  %8137 = vmatpush3.msra.mxu1 %v9266_v9 }
  0xc7   : > { %8132 = vmatpush3.msra.mxu0 %v9287_v18  ;;  %8138 = vmatprep.subr.mxu1 %v9272_v12 }
  0xc8   : > { %8133 = vmatprep.mubr.f32.mxu0 %v9291_v19  ;;  %8139 = vmatpush3.msra.mxu1 %v9272_v12 }
  0xc9   : > { %8140 = vmatprep.mubr.f32.mxu1 %v2386_v23  ;;  %8143 = vmatprep.subr.mxu0 %v9296_v20  ;;  %v9458_v23 = vand.u32 4294901760, %v3855_v16 }
  0xca   : > { %8134 = vmatmul.mubr.f32.vlgmr.msra.gmra.mxu0 %v9301_v21  ;;  %8141 = vmatmul.mubr.f32.vlgmr.msra.gmra.mxu1 %v2396_v25  ;;  %v3852_v21 = vld [vmem:[#allocation4 + $0x30] sm:$0xff] }
  0xcb   : > { %8144 = vmatpush3.msra.mxu0 %v9296_v20  ;;  %8150 = vmatprep.subr.mxu1 %v9266_v9  ;;  %v3854_v20 = vld [vmem:[#allocation5 + $0xa0] sm:$0xff]  ;;  %v3860_v27 = vsel %vm199_vm0, %v3852_v21, 0  ;;  %v9472_v30 = vsub.f32 %v3855_v16, %v9458_v23 }
  0xcc   : > { %8145 = vmatprep.subr.mxu0 %v9306_v22  ;;  %8151 = vmatpush3.msra.mxu1 %v9266_v9  ;;  %v9429_v9 = vsub.f32 %v3345_v1, %v9410_v5  ;;  %v9464_v26 = vand.u32 4294901760, %v3854_v20  ;;  %v9474_v31 = vand.u32 4294901760, %v3860_v27 }
  0xcd   : > { %8146 = vmatpush3.msra.mxu0 %v9306_v22  ;;  %8152 = vmatprep.subr.mxu1 %v9272_v12  ;;  %v3474_v22 = vand.u32 4294901760, %v3473_v14  ;;  %v9488_v34 = vand.u32 4294901760, %v9472_v30 }
  0xce   : > { %8147 = vmatprep.mubr.f32.mxu0 %v9276_v15  ;;  %8153 = vmatpush3.msra.mxu1 %v9272_v12  ;;  %v3466_v12 = vsub.f32 %v9408_v4, %v9424_v8  ;;  %v3426_v13 = vand.u32 4294901760, %v9429_v9  ;;  %v9479_v32 = vsub.f32 %v3854_v20, %v9464_v26 }
  0xcf   : > { %8154 = vmatprep.mubr.f32.mxu1 %v9276_v15  ;;  %8157 = vmatprep.subr.mxu0 %v9330_v35  ;;  %v3417_v15 = vsub.f32 %v9419_v7, %v3416_v11 }
  0xd0   : > { %8148 = vmatmul.mubr.f32.vlgmr.msra.gmra.mxu0 %v9282_v17  ;;  %8155 = vmatmul.mubr.f32.vlgmr.msra.gmra.mxu1 %v9282_v17  ;;  %v3851_v17 = vld [vmem:[#allocation4 + $0x28] sm:$0xff]  ;;  %v3467_v18 = vand.u32 4294901760, %v3466_v12  ;;  %v3427_v19 = vsub.f32 %v9429_v9, %v3426_v13  ;;  %v9498_v36 = vand.u32 4294901760, %v9479_v32 }
  0xd1   : > { %8158 = vmatpush3.msra.mxu0 %v9330_v35  ;;  %8164 = vmatprep.subr.mxu1 %v2952_v56  ;;  %v3857_v24 = vsel %vm199_vm0, %v3851_v17, 0  ;;  %v3418_v25 = vand.u32 4294901760, %v3417_v15 }
  0xd2   : > { %8159 = vmatprep.subr.mxu0 %v9336_v38  ;;  %8165 = vmatpush3.msra.mxu1 %v2952_v56  ;;  %v3428_v28 = vand.u32 4294901760, %v3427_v19  ;;  %v9468_v29 = vand.u32 4294901760, %v3857_v24  ;;  %v3988_v41 = vsub.f32 %v9479_v32, %v9498_v36 }
  0xd3   : > { %8160 = vmatpush3.msra.mxu0 %v9336_v38  ;;  %8166 = vmatprep.subr.mxu1 %v2959_v60 }
  0xd4   : > { %8161 = vmatprep.mubr.f32.mxu0 %v2903_v63  ;;  %8167 = vmatpush3.msra.mxu1 %v2959_v60  ;;  %v9483_v33 = vsub.f32 %v3857_v24, %v9468_v29 }
  0xd5   : > { %8168 = vmatprep.mubr.f32.mxu1 %v9340_v42  ;;  %8171 = vmatprep.subr.mxu0 %v9344_v43 }
  0xd6   : > { %8162 = vmatmul.mubr.f32.vlgmr.msra.gmra.mxu0 %v2913_v2  ;;  %8169 = vmatmul.mubr.f32.vlgmr.msra.gmra.mxu1 %v9346_v44  ;;  %v3931_v37 = vand.u32 4294901760, %v9483_v33 }
  0xd7   : > { %8172 = vmatpush3.msra.mxu0 %v9344_v43  ;;  %8178 = vmatprep.subr.mxu1 %v9330_v35  ;;  %v4370_v43 = vld [vmem:[#allocation5 + $0x48] sm:$0xff] }
  0xd8   : > { %8173 = vmatprep.subr.mxu0 %v9351_v45  ;;  %8179 = vmatpush3.msra.mxu1 %v9330_v35 }
  0xd9   : > { %8174 = vmatpush3.msra.mxu0 %v9351_v45  ;;  %8180 = vmatprep.subr.mxu1 %v9336_v38 }
  0xda   : > { %8175 = vmatprep.mubr.f32.mxu0 %v9355_v46  ;;  %8181 = vmatpush3.msra.mxu1 %v9336_v38 }
  0xdb   : > { %8182 = vmatprep.mubr.f32.mxu1 %v2901_v50  ;;  %8185 = vmatprep.subr.mxu0 %v9360_v40  ;;  %v9522_v50 = vand.u32 4294901760, %v4370_v43 }
  0xdc   : > { %8176 = vmatmul.mubr.f32.vlgmr.msra.gmra.mxu0 %v9365_v48  ;;  %8183 = vmatmul.mubr.f32.vlgmr.msra.gmra.mxu1 %v2911_v51  ;;  %v4367_v48 = vld [vmem:[#allocation4 + $0x11] sm:$0xff] }
  0xdd   : > { %8186 = vmatpush3.msra.mxu0 %v9360_v40  ;;  %8192 = vmatprep.subr.mxu1 %v9330_v35  ;;  %v4369_v40 = vld [vmem:[#allocation5 + $0x40] sm:$0xff]  ;;  %v4375_v53 = vsel %vm199_vm0, %v4367_v48, 0  ;;  %v9536_v56 = vsub.f32 %v4370_v43, %v9522_v50 }
  0xde   : > { %8187 = vmatprep.subr.mxu0 %v9370_v49  ;;  %8193 = vmatpush3.msra.mxu1 %v9330_v35  ;;  %v9493_v35 = vsub.f32 %v3860_v27, %v9474_v31  ;;  %v9528_v52 = vand.u32 4294901760, %v4369_v40  ;;  %v9538_v57 = vand.u32 4294901760, %v4375_v53 }
  0xdf   : > { %8188 = vmatpush3.msra.mxu0 %v9370_v49  ;;  %8194 = vmatprep.subr.mxu1 %v9336_v38  ;;  %v3989_v49 = vand.u32 4294901760, %v3988_v41  ;;  %v9552_v60 = vand.u32 4294901760, %v9536_v56 }
  0xe0   : > { %8189 = vmatprep.mubr.f32.mxu0 %v9340_v42  ;;  %8195 = vmatpush3.msra.mxu1 %v9336_v38  ;;  %v3981_v38 = vsub.f32 %v9472_v30, %v9488_v34  ;;  %v3941_v39 = vand.u32 4294901760, %v9493_v35  ;;  %v9543_v58 = vsub.f32 %v4369_v40, %v9528_v52 }
  0xe1   : > { %8196 = vmatprep.mubr.f32.mxu1 %v9340_v42  ;;  %8199 = vmatprep.subr.mxu0 %v9394_v61  ;;  %v3932_v42 = vsub.f32 %v9483_v33, %v3931_v37 }
  0xe2   : > { %8190 = vmatmul.mubr.f32.vlgmr.msra.gmra.mxu0 %v9346_v44  ;;  %8197 = vmatmul.mubr.f32.vlgmr.msra.gmra.mxu1 %v9346_v44  ;;  %v4366_v44 = vld [vmem:[#allocation4 + $0x9] sm:$0xff]  ;;  %v3982_v45 = vand.u32 4294901760, %v3981_v38  ;;  %v3942_v46 = vsub.f32 %v9493_v35, %v3941_v39  ;;  %v9562_v62 = vand.u32 4294901760, %v9543_v58 }
  0xe3   : > { %8200 = vmatpush3.msra.mxu0 %v9394_v61  ;;  %8206 = vmatprep.subr.mxu1 %v3467_v18  ;;  %v4372_v47 = vsel %vm199_vm0, %v4366_v44, 0  ;;  %v3933_v51 = vand.u32 4294901760, %v3932_v42 }
  0xe4   : > { %8201 = vmatprep.subr.mxu0 %v9400_v0  ;;  %8207 = vmatpush3.msra.mxu1 %v3467_v18  ;;  %v3943_v54 = vand.u32 4294901760, %v3942_v46  ;;  %v9532_v55 = vand.u32 4294901760, %v4372_v47  ;;  %v4503_v2 = vsub.f32 %v9543_v58, %v9562_v62 }
  0xe5   : > { %8202 = vmatpush3.msra.mxu0 %v9400_v0  ;;  %8208 = vmatprep.subr.mxu1 %v3474_v22 }
  0xe6   : > { %8203 = vmatprep.mubr.f32.mxu0 %v3418_v25  ;;  %8209 = vmatpush3.msra.mxu1 %v3474_v22  ;;  %v9547_v59 = vsub.f32 %v4372_v47, %v9532_v55 }
  0xe7   : > { %8210 = vmatprep.mubr.f32.mxu1 %v9404_v3  ;;  %8213 = vmatprep.subr.mxu0 %v9408_v4 }
  0xe8   : > { %8204 = vmatmul.mubr.f32.vlgmr.msra.gmra.mxu0 %v3428_v28  ;;  %8211 = vmatmul.mubr.f32.vlgmr.msra.gmra.mxu1 %v9410_v5  ;;  %v4446_v63 = vand.u32 4294901760, %v9547_v59 }
  0xe9   : > { %8214 = vmatpush3.msra.mxu0 %v9408_v4  ;;  %8220 = vmatprep.subr.mxu1 %v9394_v61  ;;  %v4885_v4 = vld [vmem:[#allocation5 + $0xb8] sm:$0xff] }
  0xea   : > { %8215 = vmatprep.subr.mxu0 %v9415_v6  ;;  %8221 = vmatpush3.msra.mxu1 %v9394_v61 }
  0xeb   : > { %8216 = vmatpush3.msra.mxu0 %v9415_v6  ;;  %8222 = vmatprep.subr.mxu1 %v9400_v0 }
  0xec   : > { %8217 = vmatprep.mubr.f32.mxu0 %v9419_v7  ;;  %8223 = vmatpush3.msra.mxu1 %v9400_v0 }
  0xed   : > { %8224 = vmatprep.mubr.f32.mxu1 %v3416_v11  ;;  %8227 = vmatprep.subr.mxu0 %v9424_v8  ;;  %v9586_v11 = vand.u32 4294901760, %v4885_v4 }
  0xee   : > { %8218 = vmatmul.mubr.f32.vlgmr.msra.gmra.mxu0 %v9429_v9  ;;  %8225 = vmatmul.mubr.f32.vlgmr.msra.gmra.mxu1 %v3426_v13  ;;  %v4882_v9 = vld [vmem:[#allocation4 + $0x31] sm:$0xff] }
  0xef   : > { %8228 = vmatpush3.msra.mxu0 %v9424_v8  ;;  %8234 = vmatprep.subr.mxu1 %v9394_v61  ;;  %v4884_v8 = vld [vmem:[#allocation5 + $0xb0] sm:$0xff]  ;;  %v4890_v15 = vsel %vm199_vm0, %v4882_v9, 0  ;;  %v9600_v18 = vsub.f32 %v4885_v4, %v9586_v11 }
  0xf0   : > { %8229 = vmatprep.subr.mxu0 %v9434_v10  ;;  %8235 = vmatpush3.msra.mxu1 %v9394_v61  ;;  %v9557_v61 = vsub.f32 %v4375_v53, %v9538_v57  ;;  %v9592_v14 = vand.u32 4294901760, %v4884_v8  ;;  %v9602_v19 = vand.u32 4294901760, %v4890_v15 }
  0xf1   : > { %8230 = vmatpush3.msra.mxu0 %v9434_v10  ;;  %8236 = vmatprep.subr.mxu1 %v9400_v0  ;;  %v4504_v10 = vand.u32 4294901760, %v4503_v2  ;;  %v9616_v22 = vand.u32 4294901760, %v9600_v18 }
  0xf2   : > { %8231 = vmatprep.mubr.f32.mxu0 %v9404_v3  ;;  %8237 = vmatpush3.msra.mxu1 %v9400_v0  ;;  %v4496_v0 = vsub.f32 %v9536_v56, %v9552_v60  ;;  %v4456_v1 = vand.u32 4294901760, %v9557_v61  ;;  %v9607_v20 = vsub.f32 %v4884_v8, %v9592_v14 }
  0xf3   : > { %8238 = vmatprep.mubr.f32.mxu1 %v9404_v3  ;;  %8241 = vmatprep.subr.mxu0 %v9458_v23  ;;  %v4447_v3 = vsub.f32 %v9547_v59, %v4446_v63 }
  0xf4   : > { %8232 = vmatmul.mubr.f32.vlgmr.msra.gmra.mxu0 %v9410_v5  ;;  %8239 = vmatmul.mubr.f32.vlgmr.msra.gmra.mxu1 %v9410_v5  ;;  %v4881_v5 = vld [vmem:[#allocation4 + $0x29] sm:$0xff]  ;;  %v4497_v6 = vand.u32 4294901760, %v4496_v0  ;;  %v4457_v7 = vsub.f32 %v9557_v61, %v4456_v1  ;;  %v9626_v24 = vand.u32 4294901760, %v9607_v20 }
  0xf5   : > { %8242 = vmatpush3.msra.mxu0 %v9458_v23  ;;  %8248 = vmatprep.subr.mxu1 %v3982_v45  ;;  %v4887_v12 = vsel %vm199_vm0, %v4881_v5, 0  ;;  %v4448_v13 = vand.u32 4294901760, %v4447_v3 }
  0xf6   : > { %8243 = vmatprep.subr.mxu0 %v9464_v26  ;;  %8249 = vmatpush3.msra.mxu1 %v3982_v45  ;;  %v4458_v16 = vand.u32 4294901760, %v4457_v7  ;;  %v9596_v17 = vand.u32 4294901760, %v4887_v12  ;;  %v5018_v28 = vsub.f32 %v9607_v20, %v9626_v24 }
  0xf7   : > { %8244 = vmatpush3.msra.mxu0 %v9464_v26  ;;  %8250 = vmatprep.subr.mxu1 %v3989_v49 }
  0xf8   : > { %8245 = vmatprep.mubr.f32.mxu0 %v3933_v51  ;;  %8251 = vmatpush3.msra.mxu1 %v3989_v49  ;;  %v9611_v21 = vsub.f32 %v4887_v12, %v9596_v17 }
  0xf9   : > { %8252 = vmatprep.mubr.f32.mxu1 %v9468_v29  ;;  %8255 = vmatprep.subr.mxu0 %v9472_v30 }
  0xfa   : > { %8246 = vmatmul.mubr.f32.vlgmr.msra.gmra.mxu0 %v3943_v54  ;;  %8253 = vmatmul.mubr.f32.vlgmr.msra.gmra.mxu1 %v9474_v31  ;;  %v4961_v25 = vand.u32 4294901760, %v9611_v21 }
  0xfb   : > { %8256 = vmatpush3.msra.mxu0 %v9472_v30  ;;  %8262 = vmatprep.subr.mxu1 %v9458_v23  ;;  %v5400_v30 = vld [vmem:[#allocation5 + $0x58] sm:$0xff] }
  0xfc   : > { %8257 = vmatprep.subr.mxu0 %v9479_v32  ;;  %8263 = vmatpush3.msra.mxu1 %v9458_v23 }
  0xfd   : > { %8258 = vmatpush3.msra.mxu0 %v9479_v32  ;;  %8264 = vmatprep.subr.mxu1 %v9464_v26 }
  0xfe   : > { %8259 = vmatprep.mubr.f32.mxu0 %v9483_v33  ;;  %8265 = vmatpush3.msra.mxu1 %v9464_v26 }
  0xff   : > { %8266 = vmatprep.mubr.f32.mxu1 %v3931_v37  ;;  %8269 = vmatprep.subr.mxu0 %v9488_v34  ;;  %v9650_v37 = vand.u32 4294901760, %v5400_v30 }
 0x100   : > { %8260 = vmatmul.mubr.f32.vlgmr.msra.gmra.mxu0 %v9493_v35  ;;  %8267 = vmatmul.mubr.f32.vlgmr.msra.gmra.mxu1 %v3941_v39  ;;  %v5397_v35 = vld [vmem:[#allocation4 + $0x12] sm:$0xff] }
 0x101   : > { %8270 = vmatpush3.msra.mxu0 %v9488_v34  ;;  %8276 = vmatprep.subr.mxu1 %v9458_v23  ;;  %v5399_v34 = vld [vmem:[#allocation5 + $0x50] sm:$0xff]  ;;  %v5405_v42 = vsel %vm199_vm0, %v5397_v35, 0  ;;  %v9664_v45 = vsub.f32 %v5400_v30, %v9650_v37 }
 0x102   : > { %8271 = vmatprep.subr.mxu0 %v9498_v36  ;;  %8277 = vmatpush3.msra.mxu1 %v9458_v23  ;;  %v9621_v23 = vsub.f32 %v4890_v15, %v9602_v19  ;;  %v9656_v41 = vand.u32 4294901760, %v5399_v34  ;;  %v9666_v46 = vand.u32 4294901760, %v5405_v42 }
 0x103   : > { %8272 = vmatpush3.msra.mxu0 %v9498_v36  ;;  %8278 = vmatprep.subr.mxu1 %v9464_v26  ;;  %v5019_v36 = vand.u32 4294901760, %v5018_v28  ;;  %v9680_v49 = vand.u32 4294901760, %v9664_v45 }
 0x104   : > { %8273 = vmatprep.mubr.f32.mxu0 %v9468_v29  ;;  %8279 = vmatpush3.msra.mxu1 %v9464_v26  ;;  %v5011_v26 = vsub.f32 %v9600_v18, %v9616_v22  ;;  %v4971_v27 = vand.u32 4294901760, %v9621_v23  ;;  %v9671_v40 = vsub.f32 %v5399_v34, %v9656_v41 }
 0x105   : > { %8280 = vmatprep.mubr.f32.mxu1 %v9468_v29  ;;  %8283 = vmatprep.subr.mxu0 %v9522_v50  ;;  %v4962_v29 = vsub.f32 %v9611_v21, %v4961_v25 }
 0x106   : > { %8274 = vmatmul.mubr.f32.vlgmr.msra.gmra.mxu0 %v9474_v31  ;;  %8281 = vmatmul.mubr.f32.vlgmr.msra.gmra.mxu1 %v9474_v31  ;;  %v5396_v31 = vld [vmem:[#allocation4 + $0xa] sm:$0xff]  ;;  %v5012_v32 = vand.u32 4294901760, %v5011_v26  ;;  %v4972_v33 = vsub.f32 %v9621_v23, %v4971_v27  ;;  %v9690_v47 = vand.u32 4294901760, %v9671_v40 }
 0x107   : > { %8284 = vmatpush3.msra.mxu0 %v9522_v50  ;;  %8290 = vmatprep.subr.mxu1 %v4497_v6  ;;  %v5402_v38 = vsel %vm199_vm0, %v5396_v31, 0  ;;  %v4963_v39 = vand.u32 4294901760, %v4962_v29 }
 0x108   : > { %8285 = vmatprep.subr.mxu0 %v9528_v52  ;;  %8291 = vmatpush3.msra.mxu1 %v4497_v6  ;;  %v4973_v43 = vand.u32 4294901760, %v4972_v33  ;;  %v9660_v44 = vand.u32 4294901760, %v5402_v38  ;;  %v5533_v54 = vsub.f32 %v9671_v40, %v9690_v47 }
 0x109   : > { %8286 = vmatpush3.msra.mxu0 %v9528_v52  ;;  %8292 = vmatprep.subr.mxu1 %v4504_v10 }
 0x10a   : > { %8287 = vmatprep.mubr.f32.mxu0 %v4448_v13  ;;  %8293 = vmatpush3.msra.mxu1 %v4504_v10  ;;  %v9675_v48 = vsub.f32 %v5402_v38, %v9660_v44 }
 0x10b   : > { %8294 = vmatprep.mubr.f32.mxu1 %v9532_v55  ;;  %8297 = vmatprep.subr.mxu0 %v9536_v56 }
 0x10c   : > { %8288 = vmatmul.mubr.f32.vlgmr.msra.gmra.mxu0 %v4458_v16  ;;  %8295 = vmatmul.mubr.f32.vlgmr.msra.gmra.mxu1 %v9538_v57  ;;  %v5476_v51 = vand.u32 4294901760, %v9675_v48 }
 0x10d   : > { %8298 = vmatpush3.msra.mxu0 %v9536_v56  ;;  %8304 = vmatprep.subr.mxu1 %v9522_v50  ;;  %v5915_v56 = vld [vmem:[#allocation5 + $0xc8] sm:$0xff] }
 0x10e   : > { %8299 = vmatprep.subr.mxu0 %v9543_v58  ;;  %8305 = vmatpush3.msra.mxu1 %v9522_v50 }
 0x10f   : > { %8300 = vmatpush3.msra.mxu0 %v9543_v58  ;;  %8306 = vmatprep.subr.mxu1 %v9528_v52 }
 0x110   : > { %8301 = vmatprep.mubr.f32.mxu0 %v9547_v59  ;;  %8307 = vmatpush3.msra.mxu1 %v9528_v52 }
 0x111   : > { %8308 = vmatprep.mubr.f32.mxu1 %v4446_v63  ;;  %8311 = vmatprep.subr.mxu0 %v9552_v60  ;;  %v9714_v63 = vand.u32 4294901760, %v5915_v56 }
 0x112   : > { %8302 = vmatmul.mubr.f32.vlgmr.msra.gmra.mxu0 %v9557_v61  ;;  %8309 = vmatmul.mubr.f32.vlgmr.msra.gmra.mxu1 %v4456_v1  ;;  %v5912_v61 = vld [vmem:[#allocation4 + $0x32] sm:$0xff] }
 0x113   : > { %8312 = vmatpush3.msra.mxu0 %v9552_v60  ;;  %8318 = vmatprep.subr.mxu1 %v9522_v50  ;;  %v5914_v60 = vld [vmem:[#allocation5 + $0xc0] sm:$0xff]  ;;  %v5920_v3 = vsel %vm199_vm0, %v5912_v61, 0  ;;  %v9728_v6 = vsub.f32 %v5915_v56, %v9714_v63 }
 0x114   : > { %8313 = vmatprep.subr.mxu0 %v9562_v62  ;;  %8319 = vmatpush3.msra.mxu1 %v9522_v50  ;;  %v9685_v50 = vsub.f32 %v5405_v42, %v9666_v46  ;;  %v9720_v2 = vand.u32 4294901760, %v5914_v60  ;;  %v9730_v7 = vand.u32 4294901760, %v5920_v3 }
 0x115   : > { %8314 = vmatpush3.msra.mxu0 %v9562_v62  ;;  %8320 = vmatprep.subr.mxu1 %v9528_v52  ;;  %v5534_v62 = vand.u32 4294901760, %v5533_v54  ;;  %v9744_v10 = vand.u32 4294901760, %v9728_v6 }
 0x116   : > { %8315 = vmatprep.mubr.f32.mxu0 %v9532_v55  ;;  %8321 = vmatpush3.msra.mxu1 %v9528_v52  ;;  %v5526_v52 = vsub.f32 %v9664_v45, %v9680_v49  ;;  %v5486_v53 = vand.u32 4294901760, %v9685_v50  ;;  %v9735_v8 = vsub.f32 %v5914_v60, %v9720_v2  ;;  %v6941_v60 = vld [vmem:[#allocation4 + $0x2b] sm:$0xff] }
 0x117   : > { %8322 = vmatprep.mubr.f32.mxu1 %v9532_v55  ;;  %8325 = vmatprep.subr.mxu0 %v9586_v11  ;;  %v5477_v55 = vsub.f32 %v9675_v48, %v5476_v51 }
 0x118   : > { %8316 = vmatmul.mubr.f32.vlgmr.msra.gmra.mxu0 %v9538_v57  ;;  %8323 = vmatmul.mubr.f32.vlgmr.msra.gmra.mxu1 %v9538_v57  ;;  %v5911_v57 = vld [vmem:[#allocation4 + $0x2a] sm:$0xff]  ;;  %v5527_v58 = vand.u32 4294901760, %v5526_v52  ;;  %v5487_v59 = vsub.f32 %v9685_v50, %v5486_v53  ;;  %v9754_v12 = vand.u32 4294901760, %v9735_v8 }
 0x119   : > { %8326 = vmatpush3.msra.mxu0 %v9586_v11  ;;  %8332 = vmatprep.subr.mxu1 %v5012_v32  ;;  %v5917_v0 = vsel %vm199_vm0, %v5911_v57, 0  ;;  %v5478_v1 = vand.u32 4294901760, %v5477_v55 }
 0x11a   : > { %8327 = vmatprep.subr.mxu0 %v9592_v14  ;;  %8333 = vmatpush3.msra.mxu1 %v5012_v32  ;;  %v5488_v4 = vand.u32 4294901760, %v5487_v59  ;;  %v9724_v5 = vand.u32 4294901760, %v5917_v0  ;;  %v6048_v16 = vsub.f32 %v9735_v8, %v9754_v12  ;;  %v6945_v59 = vld [vmem:[#allocation5 + $0xd8] sm:$0xff] }
 0x11b   : > { %8328 = vmatpush3.msra.mxu0 %v9592_v14  ;;  %8334 = vmatprep.subr.mxu1 %v5019_v36 }
 0x11c   : > { %8329 = vmatprep.mubr.f32.mxu0 %v4963_v39  ;;  %8335 = vmatpush3.msra.mxu1 %v5019_v36  ;;  %v9739_v9 = vsub.f32 %v5917_v0, %v9724_v5 }
 0x11d   : > { %8336 = vmatprep.mubr.f32.mxu1 %v9596_v17  ;;  %8339 = vmatprep.subr.mxu0 %v9600_v18 }
 0x11e   : > { %8330 = vmatmul.mubr.f32.vlgmr.msra.gmra.mxu0 %v4973_v43  ;;  %8337 = vmatmul.mubr.f32.vlgmr.msra.gmra.mxu1 %v9602_v19  ;;  %v5991_v13 = vand.u32 4294901760, %v9739_v9 }
 0x11f   : > { %8340 = vmatpush3.msra.mxu0 %v9600_v18  ;;  %8346 = vmatprep.subr.mxu1 %v9586_v11  ;;  %v6430_v18 = vld [vmem:[#allocation5 + $0x68] sm:$0xff] }
 0x120   : > { %8341 = vmatprep.subr.mxu0 %v9607_v20  ;;  %8347 = vmatpush3.msra.mxu1 %v9586_v11  ;;  %v9782_v26 = vand.u32 4294901760, %v6430_v18 }
 0x121   : > { %8342 = vmatpush3.msra.mxu0 %v9607_v20  ;;  %8348 = vmatprep.subr.mxu1 %v9592_v14 }
 0x122   : > { %8343 = vmatprep.mubr.f32.mxu0 %v9611_v21  ;;  %8349 = vmatpush3.msra.mxu1 %v9592_v14  ;;  %v6429_v21 = vld [vmem:[#allocation5 + $0x60] sm:$0xff]  ;;  %v9796_v35 = vsub.f32 %v6430_v18, %v9782_v26 }
 0x123   : > { %8350 = vmatprep.mubr.f32.mxu1 %v4961_v25  ;;  %8353 = vmatprep.subr.mxu0 %v9616_v22  ;;  %v6049_v25 = vand.u32 4294901760, %v6048_v16  ;;  %v9787_v29 = vand.u32 4294901760, %v6429_v21 }
 0x124   : > { %8344 = vmatmul.mubr.f32.vlgmr.msra.gmra.mxu0 %v9621_v23  ;;  %8351 = vmatmul.mubr.f32.vlgmr.msra.gmra.mxu1 %v4971_v27  ;;  %v6427_v23 = vld [vmem:[#allocation4 + $0x13] sm:$0xff]  ;;  %v9812_v42 = vand.u32 4294901760, %v9796_v35 }
 0x125   : > { %8354 = vmatpush3.msra.mxu0 %v9616_v22  ;;  %8360 = vmatprep.subr.mxu1 %v9586_v11  ;;  %v6435_v31 = vsel %vm199_vm0, %v6427_v23, 0  ;;  %v9799_v36 = vsub.f32 %v6429_v21, %v9787_v29 }
 0x126   : > { %8355 = vmatprep.subr.mxu0 %v9626_v24  ;;  %8361 = vmatpush3.msra.mxu1 %v9586_v11  ;;  %v9749_v11 = vsub.f32 %v5920_v3, %v9730_v7 }
 0x127   : > { %8356 = vmatpush3.msra.mxu0 %v9626_v24  ;;  %8362 = vmatprep.subr.mxu1 %v9592_v14 }
 0x128   : > { %8357 = vmatprep.mubr.f32.mxu0 %v9596_v17  ;;  %8363 = vmatpush3.msra.mxu1 %v9592_v14  ;;  %v6041_v14 = vsub.f32 %v9728_v6, %v9744_v10  ;;  %v6001_v15 = vand.u32 4294901760, %v9749_v11 }
 0x129   : > { %8364 = vmatprep.mubr.f32.mxu1 %v9596_v17  ;;  %8367 = vmatprep.subr.mxu0 %v9650_v37  ;;  %v5992_v17 = vsub.f32 %v9739_v9, %v5991_v13 }
 0x12a   : > { %8358 = vmatmul.mubr.f32.vlgmr.msra.gmra.mxu0 %v9602_v19  ;;  %8365 = vmatmul.mubr.f32.vlgmr.msra.gmra.mxu1 %v9602_v19  ;;  %v6426_v19 = vld [vmem:[#allocation4 + $0xb] sm:$0xff]  ;;  %v6042_v20 = vand.u32 4294901760, %v6041_v14  ;;  %v6002_v22 = vsub.f32 %v9749_v11, %v6001_v15 }
 0x12b   : > { %8368 = vmatpush3.msra.mxu0 %v9650_v37  ;;  %8374 = vmatprep.subr.mxu1 %v5527_v58  ;;  %v6432_v27 = vsel %vm199_vm0, %v6426_v19, 0  ;;  %v5993_v28 = vand.u32 4294901760, %v5992_v17 }
 0x12c   : > { %8369 = vmatprep.subr.mxu0 %v9656_v41  ;;  %8375 = vmatpush3.msra.mxu1 %v5527_v58  ;;  %v6003_v32 = vand.u32 4294901760, %v6002_v22  ;;  %v9792_v33 = vand.u32 4294901760, %v6432_v27 }
 0x12d   : > { %8370 = vmatpush3.msra.mxu0 %v9656_v41  ;;  %8376 = vmatprep.subr.mxu1 %v5534_v62 }
 0x12e   : > { %8371 = vmatprep.mubr.f32.mxu0 %v5478_v1  ;;  %8377 = vmatpush3.msra.mxu1 %v5534_v62  ;;  %v9807_v39 = vsub.f32 %v6432_v27, %v9792_v33 }
 0x12f   : > { %8378 = vmatprep.mubr.f32.mxu1 %v9660_v44  ;;  %8381 = vmatprep.subr.mxu0 %v9664_v45 }
 0x130   : > { %8372 = vmatmul.mubr.f32.vlgmr.msra.gmra.mxu0 %v5488_v4  ;;  %8379 = vmatmul.mubr.f32.vlgmr.msra.gmra.mxu1 %v9666_v46  ;;  %v6944_v4 = vld [vmem:[#allocation5 + $0xd0] sm:$0xff] }
 0x131   : > { %8382 = vmatpush3.msra.mxu0 %v9664_v45  ;;  %8388 = vmatprep.subr.mxu1 %v9650_v37 }
 0x132   : > { %8383 = vmatprep.subr.mxu0 %v9671_v40  ;;  %8389 = vmatpush3.msra.mxu1 %v9650_v37 }
 0x133   : > { %8384 = vmatpush3.msra.mxu0 %v9671_v40  ;;  %8390 = vmatprep.subr.mxu1 %v9656_v41 }
 0x134   : > { %8385 = vmatprep.mubr.f32.mxu0 %v9675_v48  ;;  %8391 = vmatpush3.msra.mxu1 %v9656_v41 }
 0x135   : > { %8392 = vmatprep.mubr.f32.mxu1 %v5476_v51  ;;  %8395 = vmatprep.subr.mxu0 %v9680_v49 }
 0x136   : > { %8386 = vmatmul.mubr.f32.vlgmr.msra.gmra.mxu0 %v9685_v50  ;;  %8393 = vmatmul.mubr.f32.vlgmr.msra.gmra.mxu1 %v5486_v53 }
 0x137   : > { %8396 = vmatpush3.msra.mxu0 %v9680_v49  ;;  %8402 = vmatprep.subr.mxu1 %v9650_v37  ;;  %v6506_v49 = vand.u32 4294901760, %v9807_v39 }
 0x138   : > { %8397 = vmatprep.subr.mxu0 %v9690_v47  ;;  %8403 = vmatpush3.msra.mxu1 %v9650_v37  ;;  %v9801_v37 = vand.u32 4294901760, %v6435_v31 }
 0x139   : > { %8398 = vmatpush3.msra.mxu0 %v9690_v47  ;;  %8404 = vmatprep.subr.mxu1 %v9656_v41  ;;  %v6556_v47 = vsub.f32 %v9796_v35, %v9812_v42  ;;  %v6507_v58 = vsub.f32 %v9807_v39, %v6506_v49 }
 0x13a   : > { %8399 = vmatprep.mubr.f32.mxu0 %v9660_v44  ;;  %8405 = vmatpush3.msra.mxu1 %v9656_v41  ;;  %v7960_v24 = vpop.f32.mrf.mxu1  ;;  %v9820_v45 = vsub.f32 %v6435_v31, %v9801_v37 }
 0x13b   : > { %8406 = vmatprep.mubr.f32.mxu1 %v9660_v44  ;;  %8409 = vmatprep.subr.mxu0 %v9714_v63  ;;  %v9817_v44 = vand.u32 4294901760, %v9799_v36  ;;  %v6557_v62 = vand.u32 4294901760, %v6556_v47 }
 0x13c   : > { %8400 = vmatmul.mubr.f32.vlgmr.msra.gmra.mxu0 %v9666_v46  ;;  %8407 = vmatmul.mubr.f32.vlgmr.msra.gmra.mxu1 %v9666_v46  ;;  %v439_v30 = vpop.f32.mrf.mxu1  ;;  %v6516_v53 = vand.u32 4294901760, %v9820_v45 }
 0x13d   : > { %8410 = vmatpush3.msra.mxu0 %v9714_v63  ;;  %8416 = vmatprep.subr.mxu1 %v6042_v20  ;;  %v6563_v52 = vsub.f32 %v9799_v36, %v9817_v44 }
 0x13e   : > { %8411 = vmatprep.subr.mxu0 %v9720_v2  ;;  %8417 = vmatpush3.msra.mxu1 %v6042_v20  ;;  %v7974_v34 = vpop.f32.mrf.mxu1 }
 0x13f   : > { %8412 = vmatpush3.msra.mxu0 %v9720_v2  ;;  %8418 = vmatprep.subr.mxu1 %v6049_v25  ;;  %v6564_v3 = vand.u32 4294901760, %v6563_v52 }
 0x140   : > { %8413 = vmatprep.mubr.f32.mxu0 %v5993_v28  ;;  %8419 = vmatpush3.msra.mxu1 %v6049_v25  ;;  %v603_v38 = vpop.f32.mrf.mxu1 }
 0x141   : > { %8420 = vmatprep.mubr.f32.mxu1 %v9724_v5  ;;  %8423 = vmatprep.subr.mxu0 %v9728_v6 }
 0x142   : > { %8414 = vmatmul.mubr.f32.vlgmr.msra.gmra.mxu0 %v6003_v32  ;;  %8421 = vmatmul.mubr.f32.vlgmr.msra.gmra.mxu1 %v9730_v7  ;;  %v7953_v41 = vpop.f32.mrf.mxu0  ;;  %v7988_v48 = vpop.f32.mrf.mxu1 }
 0x143   : > { %8424 = vmatpush3.msra.mxu0 %v9728_v6  ;;  %8430 = vmatprep.subr.mxu1 %v9714_v63  ;;  %v446_v43 = vadd.f32 %v7960_v24, %v7953_v41  ;;  %v6942_v6 = vld [vmem:[#allocation4 + $0x33] sm:$0xff] }
 0x144   : > { %8425 = vmatprep.subr.mxu0 %v9735_v8  ;;  %8431 = vmatpush3.msra.mxu1 %v9714_v63  ;;  %v348_v46 = vpop.f32.mrf.mxu0  ;;  %v767_v57 = vpop.f32.mrf.mxu1 }
 0x145   : > { %8426 = vmatpush3.msra.mxu0 %v9735_v8  ;;  %8432 = vmatprep.subr.mxu1 %v9720_v2  ;;  %v440_v40 = vadd.f32 %v439_v30, %v348_v46 }
 0x146   : > { %8427 = vmatprep.mubr.f32.mxu0 %v9739_v9  ;;  %8433 = vmatpush3.msra.mxu1 %v9720_v2  ;;  %v7967_v50 = vpop.f32.mrf.mxu0  ;;  %v9854_v9 = vand.u32 4294901760, %v6945_v59 }
 0x147   : > { %8434 = vmatprep.mubr.f32.mxu1 %v5991_v13  ;;  %8437 = vmatprep.subr.mxu0 %v9744_v10  ;;  %v529_v51 = vadd.f32 %v7967_v50, %v446_v43 }
 0x148   : > { %8428 = vmatmul.mubr.f32.vlgmr.msra.gmra.mxu0 %v9749_v11  ;;  %8435 = vmatmul.mubr.f32.vlgmr.msra.gmra.mxu1 %v6001_v15  ;;  %v521_v54 = vpop.f32.mrf.mxu0  ;;  %v9860_v15 = vand.u32 4294901760, %v6944_v4 }
 0x149   : > { %8438 = vmatpush3.msra.mxu0 %v9744_v10  ;;  %8444 = vmatprep.subr.mxu1 %v9714_v63  ;;  %v612_v55 = vadd.f32 %v7974_v34, %v529_v51  ;;  %v522_v56 = vadd.f32 %v521_v54, %v440_v40  ;;  %v6947_v10 = vsel %vm199_vm0, %v6941_v60, 0 }
 0x14a   : > { %8439 = vmatprep.subr.mxu0 %v9754_v12  ;;  %8445 = vmatpush3.msra.mxu1 %v9714_v63  ;;  %v7981_v61 = vpop.f32.mrf.mxu0  ;;  %v6517_v63 = vsub.f32 %v9820_v45, %v6516_v53  ;;  %v9864_v19 = vand.u32 4294901760, %v6947_v10  ;;  %v9875_v25 = vsub.f32 %v6944_v4, %v9860_v15 }
 0x14b   : > { %8440 = vmatpush3.msra.mxu0 %v9754_v12  ;;  %8446 = vmatprep.subr.mxu1 %v9720_v2  ;;  %v604_v0 = vadd.f32 %v603_v38, %v522_v56  ;;  %v695_v1 = vadd.f32 %v7981_v61, %v612_v55 }
 0x14c   : > { %8441 = vmatprep.mubr.f32.mxu0 %v9724_v5  ;;  %8447 = vmatpush3.msra.mxu1 %v9720_v2  ;;  %v688_v8 = vpop.f32.mrf.mxu0  ;;  %v6508_v2 = vand.u32 4294901760, %v6507_v58  ;;  %v6518_v18 = vand.u32 4294901760, %v6517_v63  ;;  %v9879_v28 = vsub.f32 %v6947_v10, %v9864_v19 }
 0x14d   : > { %8448 = vmatprep.mubr.f32.mxu1 %v9724_v5  ;;  %8451 = vmatprep.subr.mxu0 %v9782_v26  ;;  %v774_v11 = vadd.f32 %v7988_v48, %v695_v1  ;;  %v689_v12 = vadd.f32 %v688_v8, %v604_v0  ;;  %v8002_v13 = vpop.f32.mrf.mxu1  ;;  %v6950_v5 = vsel %vm199_vm0, %v6942_v6, 0 }
 0x14e   : > { %8442 = vmatmul.mubr.f32.vlgmr.msra.gmra.mxu0 %v9730_v7  ;;  %8449 = vmatmul.mubr.f32.vlgmr.msra.gmra.mxu1 %v9730_v7  ;;  %v7995_v14 = vpop.f32.mrf.mxu0  ;;  %v9868_v7 = vsub.f32 %v6945_v59, %v9854_v9  ;;  %v9870_v24 = vand.u32 4294901760, %v6950_v5  ;;  %v7021_v48 = vand.u32 4294901760, %v9879_v28 }
 0x14f   : > { %8452 = vmatpush3.msra.mxu0 %v9782_v26  ;;  %8458 = vmatprep.subr.mxu1 %v6557_v62  ;;  %v768_v16 = vadd.f32 %v767_v57, %v689_v12  ;;  %v867_v17 = vadd.f32 %v7995_v14, %v774_v11  ;;  %v947_v21 = vpop.f32.mrf.mxu1 }
 0x150   : > { %8453 = vmatprep.subr.mxu0 %v9787_v29  ;;  %8459 = vmatpush3.msra.mxu1 %v6557_v62  ;;  %v856_v20 = vpop.f32.mrf.mxu0  ;;  %v9884_v32 = vand.u32 4294901760, %v9868_v7  ;;  %v9889_v38 = vsub.f32 %v6950_v5, %v9870_v24 }
 0x151   : > { %8454 = vmatpush3.msra.mxu0 %v9787_v29  ;;  %8460 = vmatprep.subr.mxu1 %v6564_v3  ;;  %v954_v22 = vadd.f32 %v8002_v13, %v867_v17  ;;  %v857_v23 = vadd.f32 %v856_v20, %v768_v16 }
 0x152   : > { %8455 = vmatprep.mubr.f32.mxu0 %v6508_v2  ;;  %8461 = vmatpush3.msra.mxu1 %v6564_v3  ;;  %v7031_v47 = vand.u32 4294901760, %v9889_v38 }
 0x153   : > { %8462 = vmatprep.mubr.f32.mxu1 %v9792_v33  ;;  %8465 = vmatprep.subr.mxu0 %v9796_v35  ;;  %v948_v27 = vadd.f32 %v947_v21, %v857_v23 }
 0x154   : > { %8456 = vmatmul.mubr.f32.vlgmr.msra.gmra.mxu0 %v6518_v18  ;;  %8463 = vmatmul.mubr.f32.vlgmr.msra.gmra.mxu1 %v9801_v37  ;;  %v8009_v30 = vpop.f32.mrf.mxu0  ;;  %v8016_v31 = vpop.f32.mrf.mxu1 }
 0x155   : > { %8466 = vmatpush3.msra.mxu0 %v9796_v35  ;;  %8472 = vmatprep.subr.mxu1 %v9782_v26  ;;  %v1037_v34 = vadd.f32 %v8009_v30, %v954_v22  ;;  %v9894_v35 = vand.u32 4294901760, %v9875_v25 }
 0x156   : > { %8467 = vmatprep.subr.mxu0 %v9799_v36  ;;  %8473 = vmatpush3.msra.mxu1 %v9782_v26  ;;  %v1029_v41 = vpop.f32.mrf.mxu0  ;;  %v1111_v43 = vpop.f32.mrf.mxu1 }
 0x157   : > { %8468 = vmatpush3.msra.mxu0 %v9799_v36  ;;  %8474 = vmatprep.subr.mxu1 %v9787_v29  ;;  %v1120_v46 = vadd.f32 %v8016_v31, %v1037_v34  ;;  %v1030_v40 = vadd.f32 %v1029_v41, %v948_v27  ;;  %v7071_v36 = vsub.f32 %v9868_v7, %v9884_v32 }
 0x158   : > { %8469 = vmatprep.mubr.f32.mxu0 %v9807_v39  ;;  %8475 = vmatpush3.msra.mxu1 %v9787_v29  ;;  %v7078_v39 = vsub.f32 %v9875_v25, %v9894_v35 }
 0x159   : > { %8476 = vmatprep.mubr.f32.mxu1 %v6506_v49  ;;  %8479 = vmatprep.subr.mxu0 %v9812_v42  ;;  %v1112_v50 = vadd.f32 %v1111_v43, %v1030_v40 }
 0x15a   : > { %8470 = vmatmul.mubr.f32.vlgmr.msra.gmra.mxu0 %v9820_v45  ;;  %8477 = vmatmul.mubr.f32.vlgmr.msra.gmra.mxu1 %v6516_v53  ;;  %v8023_v51 = vpop.f32.mrf.mxu0  ;;  %v8030_v52 = vpop.f32.mrf.mxu1  ;;  %v7022_v45 = vsub.f32 %v9879_v28, %v7021_v48  ;;  %v7079_v57 = vand.u32 4294901760, %v7078_v39 }
 0x15b   : > { %8480 = vmatpush3.msra.mxu0 %v9812_v42  ;;  %8486 = vmatprep.subr.mxu1 %v9782_v26  ;;  %v1203_v49 = vadd.f32 %v8023_v51, %v1120_v46  ;;  %v7072_v42 = vand.u32 4294901760, %v7071_v36 }
 0x15c   : > { %8481 = vmatprep.subr.mxu0 %v9817_v44  ;;  %8487 = vmatpush3.msra.mxu1 %v9782_v26  ;;  %v1196_v53 = vpop.f32.mrf.mxu0  ;;  %v1275_v54 = vpop.f32.mrf.mxu1  ;;  %v7032_v26 = vsub.f32 %v9889_v38, %v7031_v47  ;;  %v7023_v58 = vand.u32 4294901760, %v7022_v45 }
 0x15d   : > { %8482 = vmatpush3.msra.mxu0 %v9817_v44  ;;  %8488 = vmatprep.subr.mxu1 %v9787_v29  ;;  %v9919_v55 = vadd.f32 %v8030_v52, %v1203_v49  ;;  %v1197_v56 = vadd.f32 %v1196_v53, %v1112_v50 }
 0x15e   : > { %8483 = vmatprep.mubr.f32.mxu0 %v9792_v33  ;;  %8489 = vmatpush3.msra.mxu1 %v9787_v29 }
 0x15f   : > { %8490 = vmatprep.mubr.f32.mxu1 %v9792_v33  ;;  %8493 = vmatprep.subr.mxu0 %v9854_v9  ;;  %v9928_v44 = vadd.f32 %v1275_v54, %v1197_v56  ;;  %v7033_v33 = vand.u32 4294901760, %v7032_v26 }
 0x160   : > { %8484 = vmatmul.mubr.f32.vlgmr.msra.gmra.mxu0 %v9801_v37  ;;  %8491 = vmatmul.mubr.f32.vlgmr.msra.gmra.mxu1 %v9801_v37  ;;  %v8037_v59 = vpop.f32.mrf.mxu0  ;;  %v8044_v60 = vpop.f32.mrf.mxu1 }
 0x161   : > { %8494 = vmatpush3.msra.mxu0 %v9854_v9  ;;  %8500 = vmatprep.subr.mxu1 %v7072_v42  ;;  %v1467_v29 = vadd.f32 %v8044_v60, %v8037_v59 }
 0x162   : > { %8495 = vmatprep.subr.mxu0 %v9860_v15  ;;  %8501 = vmatpush3.msra.mxu1 %v7072_v42  ;;  %v1369_v61 = vpop.f32.mrf.mxu0  ;;  %v1460_v62 = vpop.f32.mrf.mxu1 }
 0x163   : > { %8496 = vmatpush3.msra.mxu0 %v9860_v15  ;;  %8502 = vmatprep.subr.mxu1 %v7079_v57  ;;  %v1461_v0 = vadd.f32 %v1460_v62, %v1369_v61 }
 0x164   : > { %8497 = vmatprep.mubr.f32.mxu0 %v7023_v58  ;;  %8503 = vmatpush3.msra.mxu1 %v7079_v57 }
 0x165   : > { %8504 = vmatprep.mubr.f32.mxu1 %v9864_v19  ;;  %8507 = vmatprep.subr.mxu0 %v9868_v7 }
 0x166   : > { %8498 = vmatmul.mubr.f32.vlgmr.msra.gmra.mxu0 %v7033_v33  ;;  %8505 = vmatmul.mubr.f32.vlgmr.msra.gmra.mxu1 %v9870_v24  ;;  %v8051_v37 = vpop.f32.mrf.mxu0  ;;  %v8058_v1 = vpop.f32.mrf.mxu1 }
 0x167   : > { %8508 = vmatpush3.msra.mxu0 %v9868_v7  ;;  %8514 = vmatprep.subr.mxu1 %v9854_v9  ;;  %v1550_v3 = vadd.f32 %v8051_v37, %v1467_v29 }
 0x168   : > { %8509 = vmatprep.subr.mxu0 %v9875_v25  ;;  %8515 = vmatpush3.msra.mxu1 %v9854_v9  ;;  %v1542_v63 = vpop.f32.mrf.mxu0  ;;  %v1624_v4 = vpop.f32.mrf.mxu1 }
 0x169   : > { %8510 = vmatpush3.msra.mxu0 %v9875_v25  ;;  %8516 = vmatprep.subr.mxu1 %v9860_v15  ;;  %v1633_v6 = vadd.f32 %v8058_v1, %v1550_v3  ;;  %v1543_v8 = vadd.f32 %v1542_v63, %v1461_v0 }
 0x16a   : > { %8511 = vmatprep.mubr.f32.mxu0 %v9879_v28  ;;  %8517 = vmatpush3.msra.mxu1 %v9860_v15 }
 0x16b   : > { %8518 = vmatprep.mubr.f32.mxu1 %v7021_v48  ;;  %8521 = vmatprep.subr.mxu0 %v9884_v32  ;;  %v1625_v10 = vadd.f32 %v1624_v4, %v1543_v8 }
 0x16c   : > { %8512 = vmatmul.mubr.f32.vlgmr.msra.gmra.mxu0 %v9889_v38  ;;  %8519 = vmatmul.mubr.f32.vlgmr.msra.gmra.mxu1 %v7031_v47  ;;  %v8065_v11 = vpop.f32.mrf.mxu0  ;;  %v8072_v12 = vpop.f32.mrf.mxu1 }
 0x16d   : > { %8522 = vmatpush3.msra.mxu0 %v9884_v32  ;;  %8528 = vmatprep.subr.mxu1 %v9854_v9  ;;  %v1716_v13 = vadd.f32 %v8065_v11, %v1633_v6 }
 0x16e   : > { %8523 = vmatprep.subr.mxu0 %v9894_v35  ;;  %8529 = vmatpush3.msra.mxu1 %v9854_v9  ;;  %v1709_v2 = vpop.f32.mrf.mxu0  ;;  %v1788_v14 = vpop.f32.mrf.mxu1 }
 0x16f   : > { %8524 = vmatpush3.msra.mxu0 %v9894_v35  ;;  %8530 = vmatprep.subr.mxu1 %v9860_v15  ;;  %v1795_v5 = vadd.f32 %v8072_v12, %v1716_v13  ;;  %v1710_v16 = vadd.f32 %v1709_v2, %v1625_v10 }
 0x170   : > { %8525 = vmatprep.mubr.f32.mxu0 %v9864_v19  ;;  %8531 = vmatpush3.msra.mxu1 %v9860_v15 }
 0x171   : > { %8532 = vmatprep.mubr.f32.mxu1 %v9864_v19  ;;  %8526 = vmatmul.mubr.f32.vlgmr.msra.gmra.mxu0 %v9870_v24  ;;  %v1789_v17 = vadd.f32 %v1788_v14, %v1710_v16 }
 0x172   : > { %8533 = vmatmul.mubr.f32.vlgmr.msra.gmra.mxu1 %v9870_v24  ;;  %v8079_v9 = vpop.f32.mrf.mxu0  ;;  %v8086_v18 = vpop.f32.mrf.mxu1 }
 0x173   : > { %v1888_v20 = vadd.f32 %v8079_v9, %v1795_v5 }
 0x174   : > { %v1877_v21 = vpop.f32.mrf.mxu0  ;;  %v1968_v7 = vpop.f32.mrf.mxu1 }
 0x175   : > { %v1975_v22 = vadd.f32 %v8086_v18, %v1888_v20  ;;  %v1878_v23 = vadd.f32 %v1877_v21, %v1789_v17 }
 0x177   : > { %v1969_v25 = vadd.f32 %v1968_v7, %v1878_v23 }
 0x178   : > { %v8093_v27 = vpop.f32.mrf.mxu0  ;;  %v8100_v28 = vpop.f32.mrf.mxu1 }
 0x179   : > { %v2058_v30 = vadd.f32 %v8093_v27, %v1975_v22 }
 0x17a   : > { %v2050_v31 = vpop.f32.mrf.mxu0  ;;  %v2132_v15 = vpop.f32.mrf.mxu1 }
 0x17b   : > { %v2141_v32 = vadd.f32 %v8100_v28, %v2058_v30  ;;  %v2051_v19 = vadd.f32 %v2050_v31, %v1969_v25 }
 0x17d   : > { %v2133_v34 = vadd.f32 %v2132_v15, %v2051_v19 }
 0x17e   : > { %v8107_v38 = vpop.f32.mrf.mxu0  ;;  %v8114_v41 = vpop.f32.mrf.mxu1 }
 0x17f   : > { %v2224_v43 = vadd.f32 %v8107_v38, %v2141_v32 }
 0x180   : > { %v2217_v24 = vpop.f32.mrf.mxu0  ;;  %v2296_v35 = vpop.f32.mrf.mxu1 }
 0x181   : > { %v2303_v46 = vadd.f32 %v8114_v41, %v2224_v43  ;;  %v2218_v40 = vadd.f32 %v2217_v24, %v2133_v34 }
 0x183   : > { %v2297_v48 = vadd.f32 %v2296_v35, %v2218_v40 }
 0x184   : > { %v8121_v36 = vpop.f32.mrf.mxu0  ;;  %v8128_v50 = vpop.f32.mrf.mxu1 }
 0x185   : > { %v2488_v47 = vadd.f32 %v8128_v50, %v8121_v36 }
 0x186   : > { %v2390_v51 = vpop.f32.mrf.mxu0  ;;  %v2481_v52 = vpop.f32.mrf.mxu1 }
 0x187   : > { %v2482_v39 = vadd.f32 %v2481_v52, %v2390_v51 }
 0x18a   : > { %v8135_v49 = vpop.f32.mrf.mxu0  ;;  %v8142_v45 = vpop.f32.mrf.mxu1 }
 0x18b   : > { %v2571_v53 = vadd.f32 %v8135_v49, %v2488_v47 }
 0x18c   : > { %v2563_v54 = vpop.f32.mrf.mxu0  ;;  %v2645_v42 = vpop.f32.mrf.mxu1 }
 0x18d   : > { %v2654_v56 = vadd.f32 %v8142_v45, %v2571_v53  ;;  %v2564_v26 = vadd.f32 %v2563_v54, %v2482_v39 }
 0x18f   : > { %v2646_v57 = vadd.f32 %v2645_v42, %v2564_v26 }
 0x190   : > { %v8149_v58 = vpop.f32.mrf.mxu0  ;;  %v8156_v59 = vpop.f32.mrf.mxu1 }
 0x191   : > { %v2737_v60 = vadd.f32 %v8149_v58, %v2654_v56 }
 0x192   : > { %v2730_v29 = vpop.f32.mrf.mxu0  ;;  %v2809_v33 = vpop.f32.mrf.mxu1 }
 0x193   : > { %v2816_v61 = vadd.f32 %v8156_v59, %v2737_v60  ;;  %v2731_v62 = vadd.f32 %v2730_v29, %v2646_v57 }
 0x195   : > { %v2820_v0 = vadd.f32 %v2816_v61, %v9919_v55  ;;  %v2810_v37 = vadd.f32 %v2809_v33, %v2731_v62 }
 0x196   : > { %v8163_v1 = vpop.f32.mrf.mxu0  ;;  %v8170_v3 = vpop.f32.mrf.mxu1 }
 0x197   : > { %v2819_v63 = vadd.f32 %v2810_v37, %v9928_v44  ;;  %v3003_v4 = vadd.f32 %v8170_v3, %v8163_v1 }
 0x198   : > { %v2905_v6 = vpop.f32.mrf.mxu0  ;;  %v2996_v8 = vpop.f32.mrf.mxu1 }
 0x199   : > { %v2997_v10 = vadd.f32 %v2996_v8, %v2905_v6 }
 0x19c   : > { %v8177_v11 = vpop.f32.mrf.mxu0  ;;  %v8184_v12 = vpop.f32.mrf.mxu1 }
 0x19d   : > { %v3086_v13 = vadd.f32 %v8177_v11, %v3003_v4 }
 0x19e   : > { %v3078_v2 = vpop.f32.mrf.mxu0  ;;  %v3160_v14 = vpop.f32.mrf.mxu1 }
 0x19f   : > { %v3169_v5 = vadd.f32 %v8184_v12, %v3086_v13  ;;  %v3079_v16 = vadd.f32 %v3078_v2, %v2997_v10 }
 0x1a1   : > { %v3161_v17 = vadd.f32 %v3160_v14, %v3079_v16 }
 0x1a2   : > { %v8191_v9 = vpop.f32.mrf.mxu0  ;;  %v8198_v18 = vpop.f32.mrf.mxu1 }
 0x1a3   : > { %v3252_v55 = vadd.f32 %v8191_v9, %v3169_v5 }
 0x1a4   : > { %v3245_v20 = vpop.f32.mrf.mxu0  ;;  %v3324_v21 = vpop.f32.mrf.mxu1 }
 0x1a5   : > { %v3331_v7 = vadd.f32 %v8198_v18, %v3252_v55  ;;  %v3246_v22 = vadd.f32 %v3245_v20, %v3161_v17 }
 0x1a7   : > { %v3335_v44 = vadd.f32 %v3331_v7, %v2303_v46  ;;  %v3325_v23 = vadd.f32 %v3324_v21, %v3246_v22 }
 0x1a8   : > { %v8205_v25 = vpop.f32.mrf.mxu0  ;;  %v8212_v27 = vpop.f32.mrf.mxu1 }
 0x1a9   : > { %v3334_v28 = vadd.f32 %v3325_v23, %v2297_v48  ;;  %v3518_v30 = vadd.f32 %v8212_v27, %v8205_v25 }
 0x1aa   : > { %v3420_v31 = vpop.f32.mrf.mxu0  ;;  %v3511_v15 = vpop.f32.mrf.mxu1 }
 0x1ab   : > { %v3512_v32 = vadd.f32 %v3511_v15, %v3420_v31 }
 0x1ae   : > { %v8219_v19 = vpop.f32.mrf.mxu0  ;;  %v8226_v34 = vpop.f32.mrf.mxu1 }
 0x1af   : > { %v3601_v38 = vadd.f32 %v8219_v19, %v3518_v30 }
 0x1b0   : > { %v3593_v41 = vpop.f32.mrf.mxu0  ;;  %v3675_v43 = vpop.f32.mrf.mxu1 }
 0x1b1   : > { %v3684_v24 = vadd.f32 %v8226_v34, %v3601_v38  ;;  %v3594_v35 = vadd.f32 %v3593_v41, %v3512_v32 }
 0x1b3   : > { %v3676_v40 = vadd.f32 %v3675_v43, %v3594_v35 }
 0x1b4   : > { %v8233_v36 = vpop.f32.mrf.mxu0  ;;  %v8240_v50 = vpop.f32.mrf.mxu1 }
 0x1b5   : > { %v3767_v47 = vadd.f32 %v8233_v36, %v3684_v24 }
 0x1b6   : > { %v3760_v46 = vpop.f32.mrf.mxu0  ;;  %v3839_v51 = vpop.f32.mrf.mxu1 }
 0x1b7   : > { %v3846_v52 = vadd.f32 %v8240_v50, %v3767_v47  ;;  %v3761_v39 = vadd.f32 %v3760_v46, %v3676_v40 }
 0x1b9   : > { %v9965_v48 = vadd.f32 %v3846_v52, %v2820_v0  ;;  %v3840_v49 = vadd.f32 %v3839_v51, %v3761_v39 }
 0x1ba   : > { %v8247_v45 = vpop.f32.mrf.mxu0  ;;  %v8254_v53 = vpop.f32.mrf.mxu1 }
 0x1bb   : > { %10140 = vst [vmem:[#allocation18_spill] sm:$0xff] %v9965_v48  ;;  %v9967_v54 = vadd.f32 %v3840_v49, %v2819_v63  ;;  %v4033_v42 = vadd.f32 %v8254_v53, %v8247_v45 }
 0x1bc   : > { %v3935_v56 = vpop.f32.mrf.mxu0  ;;  %v4026_v26 = vpop.f32.mrf.mxu1 }
 0x1bd   : > { %10141 = vst [vmem:[#allocation19_spill] sm:$0xff] %v9967_v54  ;;  %v4027_v57 = vadd.f32 %v4026_v26, %v3935_v56 }
 0x1c0   : > { %v8261_v58 = vpop.f32.mrf.mxu0  ;;  %v8268_v59 = vpop.f32.mrf.mxu1 }
 0x1c1   : > { %v4116_v60 = vadd.f32 %v8261_v58, %v4033_v42 }
 0x1c2   : > { %v4108_v29 = vpop.f32.mrf.mxu0  ;;  %v4190_v33 = vpop.f32.mrf.mxu1 }
 0x1c3   : > { %v4199_v61 = vadd.f32 %v8268_v59, %v4116_v60  ;;  %v4109_v62 = vadd.f32 %v4108_v29, %v4027_v57 }
 0x1c5   : > { %v4191_v37 = vadd.f32 %v4190_v33, %v4109_v62 }
 0x1c6   : > { %v8275_v1 = vpop.f32.mrf.mxu0  ;;  %v8282_v0 = vpop.f32.mrf.mxu1 }
 0x1c7   : > { %v4282_v3 = vadd.f32 %v8275_v1, %v4199_v61 }
 0x1c8   : > { %v4275_v4 = vpop.f32.mrf.mxu0  ;;  %v4354_v6 = vpop.f32.mrf.mxu1 }
 0x1c9   : > { %v4361_v8 = vadd.f32 %v8282_v0, %v4282_v3  ;;  %v4276_v63 = vadd.f32 %v4275_v4, %v4191_v37 }
 0x1cb   : > { %v9969_v10 = vadd.f32 %v4361_v8, %v3335_v44  ;;  %v4355_v11 = vadd.f32 %v4354_v6, %v4276_v63 }
 0x1cc   : > { %v8289_v12 = vpop.f32.mrf.mxu0  ;;  %v8296_v13 = vpop.f32.mrf.mxu1 }
 0x1cd   : > { %10142 = vst [vmem:[#allocation20_spill] sm:$0xff] %v9969_v10  ;;  %v9971_v2 = vadd.f32 %v4355_v11, %v3334_v28  ;;  %v4548_v6 = vadd.f32 %v8296_v13, %v8289_v12 }
 0x1ce   : > { %v4450_v14 = vpop.f32.mrf.mxu0  ;;  %v4541_v5 = vpop.f32.mrf.mxu1 }
 0x1cf   : > { %10143 = vst [vmem:[#allocation21_spill] sm:$0xff] %v9971_v2  ;;  %v4542_v8 = vadd.f32 %v4541_v5, %v4450_v14 }
 0x1d2   : > { %v8303_v16 = vpop.f32.mrf.mxu0  ;;  %v9973_v17 = vpop.f32.mrf.mxu1 }
 0x1d3   : > { %v4631_v54 = vadd.f32 %v8303_v16, %v4548_v6 }
 0x1d4   : > { %v4623_v9 = vpop.f32.mrf.mxu0  ;;  %v9975_v18 = vpop.f32.mrf.mxu1 }
 0x1d5   : > { %v4624_v10 = vadd.f32 %v4623_v9, %v4542_v8  ;;  %v4714_v13 = vadd.f32 %v9973_v17, %v4631_v54 }
 0x1d7   : > { %v4706_v14 = vadd.f32 %v9975_v18, %v4624_v10 }
 0x1d8   : > { %v9977_v55 = vpop.f32.mrf.mxu0  ;;  %v9979_v20 = vpop.f32.mrf.mxu1 }
 0x1d9   : > { %10144 = vst [vmem:[#allocation22_spill] sm:$0xff] %v9979_v20 }
 0x1da   : > { %v9981_v21 = vpop.f32.mrf.mxu0  ;;  %v9983_v7 = vpop.f32.mrf.mxu1 }
 0x1db   : > { %10145 = vst [vmem:[#allocation23_spill] sm:$0xff] %v9983_v7  ;;  %v4791_v54 = vadd.f32 %v9981_v21, %v4706_v14 }
 0x1de   : > { %v8331_v22 = vpop.f32.mrf.mxu0  ;;  %v8338_v44 = vpop.f32.mrf.mxu1 }
 0x1df   : > { %v5063_v63 = vadd.f32 %v8338_v44, %v8331_v22 }
 0x1e0   : > { %v4965_v23 = vpop.f32.mrf.mxu0  ;;  %v5056_v25 = vpop.f32.mrf.mxu1 }
 0x1e2   : > { %v10156_v21 = vld [vmem:[#allocation23_spill] sm:$0xff] }
 0x1e4   : > { %v8345_v27 = vpop.f32.mrf.mxu0  ;;  %v8352_v28 = vpop.f32.mrf.mxu1 }
 0x1e6   : > { %v5138_v30 = vpop.f32.mrf.mxu0  ;;  %v9985_v31 = vpop.f32.mrf.mxu1 }
 0x1ea   : > { %v9987_v15 = vpop.f32.mrf.mxu0  ;;  %v9989_v32 = vpop.f32.mrf.mxu1 }
 0x1eb   : > { %10146 = vst [vmem:[#allocation24_spill] sm:$0xff] %v9989_v32 }
 0x1ec   : > { %v9991_v19 = vpop.f32.mrf.mxu0  ;;  %v9993_v34 = vpop.f32.mrf.mxu1 }
 0x1ed   : > { %10147 = vst [vmem:[#allocation25_spill] sm:$0xff] %v9993_v34 }
 0x1f0   : > { %v8373_v38 = vpop.f32.mrf.mxu0  ;;  %v8380_v41 = vpop.f32.mrf.mxu1 }
 0x1f1   : > { %v5578_v48 = vadd.f32 %v8380_v41, %v8373_v38 }
 0x1f2   : > { %v5480_v43 = vpop.f32.mrf.mxu0  ;;  %v5571_v24 = vpop.f32.mrf.mxu1 }
 0x1f3   : > { %v5572_v32 = vadd.f32 %v5571_v24, %v5480_v43  ;;  %v4797_v24 = vadd.f32 %v9977_v55, %v4714_v13 }
 0x1f6   : > { %v8387_v35 = vpop.f32.mrf.mxu0  ;;  %v8394_v40 = vpop.f32.mrf.mxu1 }
 0x1f7   : > { %v5661_v7 = vadd.f32 %v8387_v35, %v5578_v48 }
 0x1f8   : > { %v5653_v36 = vpop.f32.mrf.mxu0  ;;  %v5735_v50 = vpop.f32.mrf.mxu1 }
 0x1f9   : > { %v5654_v5 = vadd.f32 %v5653_v36, %v5572_v32  ;;  %v5744_v38 = vadd.f32 %v8394_v40, %v5661_v7 }
 0x1fb   : > { %v5736_v35 = vadd.f32 %v5735_v50, %v5654_v5 }
 0x1fc   : > { %v9995_v47 = vpop.f32.mrf.mxu0  ;;  %v9997_v46 = vpop.f32.mrf.mxu1 }
 0x1fd   : > { %10148 = vst [vmem:[#allocation26_spill] sm:$0xff] %v9997_v46  ;;  %v5827_v32 = vadd.f32 %v9995_v47, %v5744_v38 }
 0x1fe   : > { %v9999_v51 = vpop.f32.mrf.mxu0  ;;  %v10001_v52 = vpop.f32.mrf.mxu1 }
 0x1ff   : > { %10149 = vst [vmem:[#allocation27_spill] sm:$0xff] %v9999_v51  ;;  %10150 = vst [vmem:[#allocation28_spill] sm:$0xff] %v10001_v52  ;;  %v5057_v52 = vadd.f32 %v5056_v25, %v4965_v23 }
 0x202   : > { %v8415_v39 = vpop.f32.mrf.mxu0  ;;  %v8422_v49 = vpop.f32.mrf.mxu1 }
 0x204   : > { %v5995_v45 = vpop.f32.mrf.mxu0  ;;  %v6086_v53 = vpop.f32.mrf.mxu1 }
 0x205   : > { %v6087_v51 = vadd.f32 %v6086_v53, %v5995_v45  ;;  %v4870_v45 = vadd.f32 %v10156_v21, %v4791_v54 }
 0x208   : > { %v8429_v42 = vpop.f32.mrf.mxu0  ;;  %v8436_v56 = vpop.f32.mrf.mxu1 }
 0x20a   : > { %v6168_v26 = vpop.f32.mrf.mxu0  ;;  %v6250_v57 = vpop.f32.mrf.mxu1 }
 0x20b   : > { %v6169_v9 = vadd.f32 %v6168_v26, %v6087_v51  ;;  %v10154_v51 = vld [vmem:[#allocation22_spill] sm:$0xff] }
 0x20d   : > { %v6251_v17 = vadd.f32 %v6250_v57, %v6169_v9  ;;  %v10159_v57 = vld [vmem:[#allocation25_spill] sm:$0xff]  ;;  %v10166_v9 = vld [vmem:[#allocation19_spill] sm:$0xff] }
 0x20e   : > { %v8443_v58 = vpop.f32.mrf.mxu0  ;;  %v10003_v59 = vpop.f32.mrf.mxu1 }
 0x20f   : > { %10151 = vst [vmem:[#allocation29_spill] sm:$0xff] %v10003_v59  ;;  %v5146_v59 = vadd.f32 %v8345_v27, %v5063_v63  ;;  %v10164_v63 = vld [vmem:[#allocation20_spill] sm:$0xff] }
 0x210   : > { %v10005_v60 = vpop.f32.mrf.mxu0  ;;  %v10007_v29 = vpop.f32.mrf.mxu1 }
 0x211   : > { %10152 = vst [vmem:[#allocation30_spill] sm:$0xff] %v10005_v60  ;;  %10153 = vst [vmem:[#allocation31_spill] sm:$0xff] %v10007_v29  ;;  %v6093_v29 = vadd.f32 %v8422_v49, %v8415_v39  ;;  %v5139_v60 = vadd.f32 %v5138_v30, %v5057_v52  ;;  %v5229_v16 = vadd.f32 %v8352_v28, %v5146_v59  ;;  %v10155_v39 = vld [vmem:[#allocation27_spill] sm:$0xff]  ;;  %v10160_v59 = vld [vmem:[#allocation26_spill] sm:$0xff] }
 0x212   : > { %v4876_v52 = vadd.f32 %v10154_v51, %v4797_v24  ;;  %v5821_v55 = vadd.f32 %v10155_v39, %v5736_v35 }
 0x213   : > { %v6176_v20 = vadd.f32 %v8429_v42, %v6093_v29  ;;  %v5221_v27 = vadd.f32 %v9985_v31, %v5139_v60  ;;  %v5312_v10 = vadd.f32 %v9987_v15, %v5229_v16  ;;  %v10157_v15 = vld [vmem:[#allocation24_spill] sm:$0xff]  ;;  %v5906_v60 = vadd.f32 %v10160_v59, %v5827_v32 }
 0x214   : > { %v8457_v33 = vpop.f32.mrf.mxu0  ;;  %v8464_v61 = vpop.f32.mrf.mxu1 }
 0x215   : > { %v6608_v12 = vadd.f32 %v8464_v61, %v8457_v33  ;;  %v6259_v30 = vadd.f32 %v8436_v56, %v6176_v20  ;;  %v5306_v28 = vadd.f32 %v9991_v19, %v5221_v27  ;;  %v5391_v53 = vadd.f32 %v10157_v15, %v5312_v10 }
 0x216   : > { %v6510_v62 = vpop.f32.mrf.mxu0  ;;  %v6601_v37 = vpop.f32.mrf.mxu1  ;;  %v10161_v61 = vld [vmem:[#allocation29_spill] sm:$0xff] }
 0x217   : > { %v6602_v22 = vadd.f32 %v6601_v37, %v6510_v62  ;;  %v6342_v31 = vadd.f32 %v8443_v58, %v6259_v30  ;;  %v5385_v58 = vadd.f32 %v10159_v57, %v5306_v28 }
 0x218   : > { %v10158_v42 = vld [vmem:[#allocation30_spill] sm:$0xff] }
 0x219   : > { %v6336_v56 = vadd.f32 %v10158_v42, %v6251_v17  ;;  %v6421_v62 = vadd.f32 %v10161_v61, %v6342_v31 }
 0x21a   : > { %v8471_v1 = vpop.f32.mrf.mxu0  ;;  %v8478_v0 = vpop.f32.mrf.mxu1 }
 0x21b   : > { %v6691_v44 = vadd.f32 %v8471_v1, %v6608_v12  ;;  %v10162_v1 = vld [vmem:[#allocation18_spill] sm:$0xff]  ;;  %v5395_v12 = vadd.f32 %v5391_v53, %v10164_v63 }
 0x21c   : > { %v6683_v3 = vpop.f32.mrf.mxu0  ;;  %v6765_v4 = vpop.f32.mrf.mxu1 }
 0x21d   : > { %v6684_v41 = vadd.f32 %v6683_v3, %v6602_v22  ;;  %v6774_v18 = vadd.f32 %v8478_v0, %v6691_v44  ;;  %v4880_v0 = vadd.f32 %v4876_v52, %v10162_v1  ;;  %v10163_v3 = vld [vmem:[#allocation28_spill] sm:$0xff]  ;;  %v4879_v22 = vadd.f32 %v4870_v45, %v10166_v9  ;;  %v10167_v44 = vld [vmem:[#allocation21_spill] sm:$0xff] }
 0x21e   : > { %v6425_v27 = vadd.f32 %v6421_v62, %v5395_v12 }
 0x21f   : > { %v6766_v7 = vadd.f32 %v6765_v4, %v6684_v41  ;;  %v5900_v4 = vadd.f32 %v10163_v3, %v5821_v55 }
 0x220   : > { %v8485_v11 = vpop.f32.mrf.mxu0  ;;  %v10009_v2 = vpop.f32.mrf.mxu1 }
 0x221   : > { %v6857_v19 = vadd.f32 %v8485_v11, %v6774_v18  ;;  %v10165_v11 = vld [vmem:[#allocation31_spill] sm:$0xff] }
 0x222   : > { %v6850_v46 = vpop.f32.mrf.mxu0  ;;  %v10011_v34 = vpop.f32.mrf.mxu1  ;;  %v6415_v13 = vadd.f32 %v10165_v11, %v6336_v56 }
 0x223   : > { %v6851_v37 = vadd.f32 %v6850_v46, %v6766_v7  ;;  %v6936_v14 = vadd.f32 %v10009_v2, %v6857_v19 }
 0x225   : > { %v6930_v38 = vadd.f32 %v10011_v34, %v6851_v37 }
 0x226   : > { %v8499_v23 = vpop.f32.mrf.mxu0  ;;  %v8506_v25 = vpop.f32.mrf.mxu1 }
 0x227   : > { %v7123_v36 = vadd.f32 %v8506_v25, %v8499_v23  ;;  %v5394_v23 = vadd.f32 %v5385_v58, %v10167_v44  ;;  %v5910_v25 = vadd.f32 %v5906_v60, %v4880_v0 }
 0x228   : > { %v7025_v48 = vpop.f32.mrf.mxu0  ;;  %v7116_v43 = vpop.f32.mrf.mxu1 }
 0x229   : > { %v7117_v50 = vadd.f32 %v7116_v43, %v7025_v48  ;;  %v5909_v48 = vadd.f32 %v5900_v4, %v4879_v22  ;;  %v6424_v24 = vadd.f32 %v6415_v13, %v5394_v23  ;;  %v6940_v35 = vadd.f32 %v6936_v14, %v5910_v25 }
 0x22b   : > { %v6939_v2 = vadd.f32 %v6930_v38, %v5909_v48 }
 0x22c   : > { %v8513_v20 = vpop.f32.mrf.mxu0  ;;  %v8520_v40 = vpop.f32.mrf.mxu1 }
 0x22d   : > { %v7206_v49 = vadd.f32 %v8513_v20, %v7123_v36 }
 0x22e   : > { %v7198_v26 = vpop.f32.mrf.mxu0  ;;  %v7280_v47 = vpop.f32.mrf.mxu1 }
 0x22f   : > { %v7289_v29 = vadd.f32 %v8520_v40, %v7206_v49  ;;  %v7199_v33 = vadd.f32 %v7198_v26, %v7117_v50 }
 0x231   : > { %v7281_v6 = vadd.f32 %v7280_v47, %v7199_v33  ;;  %v8527_v8 = vpop.f32.mrf.mxu0 }
 0x232   : > { %v7372_v5 = vadd.f32 %v8527_v8, %v7289_v29  ;;  %v8534_v16 = vpop.f32.mrf.mxu1 }
 0x233   : > { %v7365_v46 = vpop.f32.mrf.mxu0 }
 0x234   : > { %v7451_v30 = vadd.f32 %v8534_v16, %v7372_v5  ;;  %v7366_v41 = vadd.f32 %v7365_v46, %v7281_v6  ;;  %v7444_v43 = vpop.f32.mrf.mxu1 }
 0x236   : > { %v7455_v54 = vadd.f32 %v7451_v30, %v6425_v27  ;;  %v7445_v10 = vadd.f32 %v7444_v43, %v7366_v41 }
 0x238   : > { %v7457_v17 = vadd.f32 %v7455_v54, %v6940_v35  ;;  %v7454_v18 = vadd.f32 %v7445_v10, %v6424_v24 }
 0x23a   : > { %v7603_v28 = vmul.f32 -1.442695, %v7457_v17  ;;  %v7456_v32 = vadd.f32 %v7454_v18, %v6939_v2 }
 0x23c   : > { %8653 = vpow2.f32 %v7603_v28  ;;  %v7602_v36 = vmul.f32 -1.442695, %v7456_v32 }
 0x23e   : > { %8655 = vpow2.f32 %v7602_v36 }
 0x249   : > { %v8654_v31 = vpop.eup %8653 }
 0x24a   : > { %v7465_v34 = vadd.f32 1.0, %v8654_v31 }
 0x24b   : > { %v8656_v7 = vpop.eup %8655 }
 0x24c   : > { %8657 = vrcp.f32 %v7465_v34  ;;  %v7464_v20 = vadd.f32 1.0, %v8656_v7 }
 0x24e   : > { %8659 = vrcp.f32 %v7464_v20 }
 0x259   : > { %v8658_v40 = vpop.eup %8657 }
 0x25a   : > { %7471 = vst.msk [vmem:[%s9030_s22 + $0x8] sm:$0xff] %vm199_vm0, %v8658_v40 }
 0x25b   : > { %v8660_v51 = vpop.eup %8659 }
 0x25c   : > { %7470 = vst.msk [vmem:[%s9030_s22] sm:$0xff] %vm199_vm0, %v8660_v51 }
 0x25d PF: > { %s10168_s15 = sld [smem:[#allocation15_spill]]  ;;  %s7610_s24 = sshll.u32 %s8827_s16, 8 }
 0x25e   : > { %s10169_s23 = sld [smem:[#allocation33_spill]]  ;;  %s7486_s12 = sshll.u32 %s9030_s22, 4  ;;  %s10048_s12 = int_to_ptr.vmem [resolvable:$true] %s7486_s12 }
 0x25f   : > { %s10052_s0 = scalar_lea.sflag [#allocation7], %s191_s25  ;;  %s8715_s9 = scalar_lea.vmem %s10048_s12, 256 }
 0x260   : > { %p8716_p2 = scmp.ne.s32.totalorder %s10048_s12, %s8715_s9  ;;  %s8846_s16 = smov [#allocation10]  }
 0x261   : > { %s8719_s7 = sshll.u32 %s8846_s16, 4  ;;  %s8720_s7 = int_to_ptr.vmem [resolvable:$false] %s8719_s7 }
 0x262   : > { %s8721_s21 = scalar_lea.vmem %s8720_s7, 512  ;;  %p8722_p8 = scmp.lt.s32.totalorder %s10048_s12, %s8720_s7 }
 0x263   : > { %p10170_p4 = scmp.ne.s32.totalorder %s10168_s15, 0  ;;  %p8723_p7 = scmp.lt.s32.totalorder %s8721_s21, %s8715_s9 }
 0x264   : > { %s10045_s5 = scalar_lea.hbm %s10169_s23, %s7610_s24 }
 0x265   : > { %p8717_p5 = pnand %p8716_p2, %p10170_p4  ;;  %p8724_p9 = por %p8723_p7, %p8722_p8 }
 0x267   : > { %p8718_p6 = pneg %p8717_p5 }
 0x269   : > { %p8725_p10 = pnand %p8724_p9, %p8718_p6 }
 0x26b   : > { %8728 = shalt.err (!%p8725_p10)
}
 0x26c   : > { %s8729_s2 = scalar_lea.hbm %s10045_s5, 256  ;;  %s8733_s6 = scalar_lea.hbm %s10169_s23, 512 }
 0x26d   : > { %p8730_p12 = scmp.ne.s32.totalorder %s10045_s5, %s8729_s2  ;;  %p8734_p1 = scmp.lt.s32.totalorder %s10045_s5, %s10169_s23 }
 0x26e   : > { %p8735_p3 = scmp.lt.s32.totalorder %s8733_s6, %s8729_s2 }
 0x26f   : > { %p8731_p0 = pnand %p8730_p12, %p10170_p4 }
 0x270   : > { %p8736_p11 = por %p8735_p3, %p8734_p1 }
 0x271   : > { %p8732_p13 = pneg %p8731_p0 }
 0x273   : > { %p8737_p2 = pnand %p8736_p11, %p8732_p13 }
 0x275   : > { %8740 = shalt.err (!%p8737_p2)
}
 0x276   : > { %s8847_s26 = smov 128   ;;  %s8848_s22 = smov 8  }
 0x277   : > { %8541 = dma.vmem_to_hbm [thread:$0]  (%p10170_p4), %s10048_s12, 256, %s10045_s5, %s10052_s0, %s8847_s26, %s8847_s26, %s8848_s22  }
 0x278 PF: > { %s10171_s24 = sld [smem:[#allocation14_spill]]  ;;  %p8558_p5 = scmp.ge.s32.totalorder %s8839_s19, 2 }
 0x279   : > { %s10172_s27 = sld [smem:[#allocation16_spill]] }
 0x27e   : > { %s7501_s30 = sand.u32 1, %s10171_s24  }
 0x27f   : > { %p10173_p6 = scmp.ne.s32.totalorder %s10172_s27, 0  ;;  %s7502_s9 = scalar_lea.sflag [#allocation7], %s7501_s30 }
 0x281   : > { %p8552_p8 = pnand %p8558_p5, %p10173_p6 }
 0x283   : > { %p8553_p7 = pneg %p8552_p8 }
 0x285   : > { %8794 = dma.done.wait (%p8553_p7), %s7502_s9, 256  }
 0x286   : > { %8796 = vsyncadd (%p8553_p7), %s7502_s9, 4294967040  ;;  %s19_s19 = sadd.s32 1, %s8839_s19   ;;  %s10174_s5 = sld [smem:[#allocation17_spill]] }
 0x287   : > { %p16_p9 = scmp.ge.s32.totalorder %s19_s19, 6   ;;  %s10175_s9 = smov %s8803_s10 }
 0x288   : > { %s10176_s10 = smov %s8807_s11  ;;  %s10177_s11 = smov %s8984_s3 }
 0x289   : > { %s10178_s12 = smov %s8815_s13  ;;  %s10179_s13 = smov %s8819_s14 }
 0x28a   : > { %s10180_s14 = smov %s8987_s4  ;;  %s10181_s15 = smov %s8831_s17 }
 0x28b   : > { %s10182_s16 = smov %s8835_s18  ;;  %s10184_s18 = smov %s10190_s8 }
 0x28c   : > { %s10183_s17 = smov %s10174_s5  ;;  %18 = sbr.rel (!%p16_p9) target bundleno = 13 (0xd), region = 104 }
 0x291   :  { %7507 = vsyncpa [#allocation6], 1 }
 0x292   :  { %7509 = vsyncpa [#allocation6 + $0x1], 1 }
 0x293   :  { %7510 = vsyncpa [#allocation9], 1 }
 0x294   :  { %7512 = vsyncpa [#allocation9 + $0x1], 1 }
 0x295   :  { %7513 = vsyncpa [#allocation7], 1 }
 0x296   :  { %7515 = vsyncpa [#allocation7 + $0x1], 1 }

</bundles_post_ra>
